<compile_context>
chip_gen: v5e
topology: v5e:2x2
jax: 0.10.0
libtpu: 0.0.40
codegen_flags: <defaults>
</compile_context>

<pallas_src>
import math
from functools import partial

import numpy as np
import jax
import jax.numpy as jnp
from jax import lax
from jax.experimental import pallas as pl
from jax.experimental.pallas import tpu as pltpu


# ----------------------------------------------------------------------------
# deterministic constant generators (match the PyTorch helpers)
# ----------------------------------------------------------------------------
def gen_timing_signal(length, channels, min_timescale=1.0, max_timescale=1.0e4):
    position = np.arange(length).astype(np.float64)
    num_timescales = channels // 2
    log_timescale_increment = math.log(float(max_timescale) / float(min_timescale)) / max(
        float(num_timescales) - 1, 1.0
    )
    inv_timescales = min_timescale * np.exp(
        np.arange(num_timescales).astype(np.float64) * -log_timescale_increment
    )
    scaled_time = position[:, None] * inv_timescales[None, :]
    signal = np.concatenate([np.sin(scaled_time), np.cos(scaled_time)], axis=1)
    signal = np.pad(signal, [[0, 0], [0, channels % 2]], "constant")
    return jnp.asarray(signal, dtype=jnp.float32)  # [length, channels]


def gen_subsequent_mask(size):
    return jnp.asarray(np.triu(np.ones((1, size, size)), k=1), dtype=jnp.int32)


# ----------------------------------------------------------------------------
# in-kernel helpers
# ----------------------------------------------------------------------------
def _layer_norm(v, g, b, eps=1e-6):
    # matches the custom LayerNorm: torch.std (unbiased), divide by (std + eps)
    m = jnp.mean(v, axis=-1, keepdims=True)
    d = v - m
    var = jnp.sum(d * d, axis=-1, keepdims=True) / (v.shape[-1] - 1)
    return g * d / (jnp.sqrt(var) + eps) + b


# ----------------------------------------------------------------------------
# fused decoder kernel: one grid step = (batch block b, layer l)
# ----------------------------------------------------------------------------
def decoder_kernel(
    inp_ref, enc_ref, causal_ref, trg_ref, src_ref, emb_w_ref, timing_ref,
    wqkv_s_ref, wo_s_ref, wq_c_ref, wkv_c_ref, wo_c_ref,
    ln1_g_ref, ln1_b_ref, ln2_g_ref, ln2_b_ref, ln3_g_ref, ln3_b_ref,
    c1_w_ref, c1_b_ref, c2_w_ref, c2_b_ref,
    lnf_g_ref, lnf_b_ref,
    y_ref, attn_ref,
    x_acc, ctx_slab, cat1, cat2,
    *, num_layers, num_heads, kdh, vdh, kd, bblk, key_scale, cdt,
):
    l = pl.program_id(1)
    T = causal_ref.shape[0]
    R, H = x_acc.shape
    F = cat2.shape[1] // 3

    # ---- layer 0: embedding projection + timing signal (residual stream init) --
    @pl.when(l == 0)
    def _():
        x0 = jnp.dot(inp_ref[0], emb_w_ref[...], preferred_element_type=jnp.float32)
        x_acc[...] = x0 + timing_ref[...]

    x = x_acc[...]                                        # [R, H] f32, R = bblk*T

    # within-sample row masks for the causal conv shifts (pure VPU, hoisted)
    rows = lax.broadcasted_iota(jnp.int32, (R, 1), 0)
    tpos = (rows & (T - 1)) if (T & (T - 1)) == 0 else (rows % T)
    row_ge1 = (tpos >= 1).astype(jnp.float32)
    row_ge2 = (tpos >= 2).astype(jnp.float32)

    def shift1(v):  # y[t] = v[t-1] within each sample, 0 for t < 1
        return pltpu.roll(v, 1, 0) * row_ge1

    def shift2(v):  # y[t] = v[t-2] within each sample, 0 for t < 2
        return pltpu.roll(v, 2, 0) * row_ge2

    def attend(qb, kb, vb, add_mask, row0):
        # per-head softmax attention; head contexts land in the ctx slab lanes
        nq = qb.shape[0]
        for h in range(num_heads):                         # small static unroll
            qh = qb[:, h * kdh:(h + 1) * kdh]
            kh = kb[:, h * kdh:(h + 1) * kdh]
            vh = vb[:, h * vdh:(h + 1) * vdh]
            logits = lax.dot_general(
                qh, kh, (((1,), (1,)), ((), ())), preferred_element_type=jnp.float32
            ) + add_mask                                   # ≡ masked_fill(-1e18) in f32
            m = jnp.max(logits, axis=-1, keepdims=True)
            e = jnp.exp(logits - m)
            w = e * pl.reciprocal(jnp.sum(e, axis=-1, keepdims=True), approx=True)
            ctx_slab[row0:row0 + nq, h * vdh:(h + 1) * vdh] = jnp.dot(
                w, vh, preferred_element_type=jnp.float32)

    # ---------------- masked multi-head self attention (pre-LN) -----------------
    x_norm = _layer_norm(x, ln1_g_ref[0], ln1_b_ref[0])
    qkv = jnp.dot(x_norm.astype(cdt), wqkv_s_ref[0],
                  preferred_element_type=jnp.float32)      # [R, 2KD+VD]
    q = qkv[:, :kd] * key_scale
    k = qkv[:, kd:2 * kd]
    v = qkv[:, 2 * kd:]
    for bi in range(bblk):
        r0 = bi * T
        dmask = jnp.minimum(causal_ref[...], trg_ref[bi])  # [T, T] additive
        attend(q[r0:r0 + T], k[r0:r0 + T], v[r0:r0 + T], dmask, r0)
    x = x + jnp.dot(ctx_slab[...].astype(cdt), wo_s_ref[0],
                    preferred_element_type=jnp.float32)    # ONE wide out-projection

    # ---------------- encoder-decoder attention (pre-LN) ------------------------
    x_norm = _layer_norm(x, ln2_g_ref[0], ln2_b_ref[0])
    q = jnp.dot(x_norm.astype(cdt), wq_c_ref[0],
                preferred_element_type=jnp.float32) * key_scale      # [R, KD]
    for bi in range(bblk):
        r0 = bi * T
        kv = jnp.dot(enc_ref[bi], wkv_c_ref[0], preferred_element_type=jnp.float32)
        kb = kv[:, :kd]
        vb = kv[:, kd:]
        smask = src_ref[bi]                                # [1, S] additive
        qb = q[r0:r0 + T]
        attend(qb, kb, vb, smask, r0)

        # attn_dist only for the LAST layer: sum_h(qh.kh^T + m)/nh == q.k^T/nh + m
        @pl.when(l == num_layers - 1)
        def _(qb=qb, kb=kb, smask=smask, bi=bi):
            attn_ref[bi] = (
                lax.dot_general(qb, kb, (((1,), (1,)), ((), ())),
                                preferred_element_type=jnp.float32)
                * (1.0 / num_heads) + smask)
    x = x + jnp.dot(ctx_slab[...].astype(cdt), wo_c_ref[0],
                    preferred_element_type=jnp.float32)

    # ------ positionwise FFN: two fused causal convs (k=3, left pad), ReLU each --
    x_norm = _layer_norm(x, ln3_g_ref[0], ln3_b_ref[0])
    cat1[:, 0:H] = x_norm
    cat1[:, H:2 * H] = shift1(x_norm)
    cat1[:, 2 * H:3 * H] = shift2(x_norm)
    h1 = jnp.maximum(
        jnp.dot(cat1[...].astype(cdt), c1_w_ref[0],
                preferred_element_type=jnp.float32) + c1_b_ref[0], 0.0)
    cat2[:, 0:F] = h1
    cat2[:, F:2 * F] = shift1(h1)
    cat2[:, 2 * F:3 * F] = shift2(h1)
    # ReLU applied after the last conv too (replicates `if i < len(self.layers)`)
    h2 = jnp.maximum(
        jnp.dot(cat2[...].astype(cdt), c2_w_ref[0],
                preferred_element_type=jnp.float32) + c2_b_ref[0], 0.0)
    x = x + h2

    x_acc[...] = x                                        # carry to the next layer

    # -------------------- final LayerNorm at the last layer ---------------------
    @pl.when(l == num_layers - 1)
    def _():
        yfin = _layer_norm(x, lnf_g_ref[...], lnf_b_ref[...])
        for bi in range(bblk):
            y_ref[bi] = yfin[bi * T:(bi + 1) * T]


# ----------------------------------------------------------------------------
# pallas_call wrapper
# ----------------------------------------------------------------------------
def _pack_conv(w):
    # w: [L*3, Cin, Cout]; tap k of layer l at index 3l+k; tap0 -> x[t-2], tap2 -> x[t].
    # packed rows: [0:Cin]=x[t] tap, [Cin:2Cin]=x[t-1] tap, [2Cin:3Cin]=x[t-2] tap.
    l3, cin, cout = w.shape
    L = l3 // 3
    return w.reshape(L, 3, cin, cout)[:, ::-1].reshape(L, 3 * cin, cout)


def decoder_forward(params, inputs, encoder_output, mask, *, num_heads,
                    total_key_depth, bblk=1, compute_dtype=jnp.bfloat16):
    mask_src, mask_trg = mask            # boolean padding masks (True = padded)
    B, T, E = inputs.shape
    S = encoder_output.shape[1]
    H = params["emb_w"].shape[1]
    L = params["wq_s"].shape[0]
    KD = params["wq_s"].shape[-1]
    VD = params["wv_s"].shape[-1]
    F = params["c1_b"].shape[-1]
    kdh, vdh = KD // num_heads, VD // num_heads
    key_scale = float((total_key_depth // num_heads) ** -0.5)
    assert B % bblk == 0, "batch must be divisible by bblk"
    nb = B // bblk
    R = bblk * T
    cdt = compute_dtype

    sub = params["subsequent_mask"][0, :T, :T]
    causal_add = jnp.where(sub > 0, -1e18, 0.0).astype(jnp.float32)      # [T, T]
    trg_add = jnp.where(mask_trg, -1e18, 0.0).astype(jnp.float32)        # [B, 1, T]
    src_add = jnp.where(mask_src, -1e18, 0.0).astype(jnp.float32)        # [B, 1, S]
    timing_t = jnp.tile(params["timing_signal"][:T], (bblk, 1))          # [R, H]

    # --- packed / fused weights, cast once to the MXU compute dtype -------------
    wqkv_s = jnp.concatenate(
        [params["wq_s"], params["wk_s"], params["wv_s"]], axis=-1).astype(cdt)
    wkv_c = jnp.concatenate([params["wk_c"], params["wv_c"]], axis=-1).astype(cdt)
    wq_c = params["wq_c"].astype(cdt)
    wo_s = params["wo_s"].astype(cdt)
    wo_c = params["wo_c"].astype(cdt)
    emb_w = params["emb_w"].astype(cdt)
    c1_w = _pack_conv(params["c1_w"]).astype(cdt)                        # [L, 3H, F]
    c2_w = _pack_conv(params["c2_w"]).astype(cdt)                        # [L, 3F, H]

    inputs_r = inputs.reshape(nb, R, E).astype(cdt)
    enc_c = encoder_output.astype(cdt)

    # TODO(synk): universal/ACT branch of the reference module not implemented
    # (universal=False path only); dropouts are identity in inference mode.
    # TODO(synk): outputs are not padded to 128 lanes (lane-dense stores); at the
    # tiny demo shapes (H=32, S=10) the masked partial stores are negligible.
    args = (
        inputs_r, enc_c, causal_add, trg_add, src_add, emb_w, timing_t,
        wqkv_s, wo_s, wq_c, wkv_c, wo_c,
        params["ln1_g"], params["ln1_b"], params["ln2_g"], params["ln2_b"],
        params["ln3_g"], params["ln3_b"],
        c1_w, params["c1_b"], c2_w, params["c2_b"],
        params["ln_g"], params["ln_b"],
    )

    def batched(a):
        nd = a.ndim
        return pl.BlockSpec((bblk,) + tuple(a.shape[1:]),
                            lambda b, l, _nd=nd: (b,) + (0,) * (_nd - 1))

    def per_layer(a):
        nd = a.ndim
        return pl.BlockSpec((1,) + tuple(a.shape[1:]),
                            lambda b, l, _nd=nd: (l,) + (0,) * (_nd - 1))

    def const(a):
        nd = a.ndim
        return pl.BlockSpec(tuple(a.shape), lambda b, l, _nd=nd: (0,) * _nd)

    in_specs = [
        pl.BlockSpec((1, R, E), lambda b, l: (b, 0, 0)),   # flattened input rows
        batched(enc_c), const(causal_add), batched(trg_add), batched(src_add),
        const(emb_w), const(timing_t),
        per_layer(wqkv_s), per_layer(wo_s), per_layer(wq_c), per_layer(wkv_c),
        per_layer(wo_c),
        per_layer(params["ln1_g"]), per_layer(params["ln1_b"]),
        per_layer(params["ln2_g"]), per_layer(params["ln2_b"]),
        per_layer(params["ln3_g"]), per_layer(params["ln3_b"]),
        per_layer(c1_w), per_layer(params["c1_b"]),
        per_layer(c2_w), per_layer(params["c2_b"]),
        const(params["ln_g"]), const(params["ln_b"]),
    ]
    out_specs = (pl.BlockSpec((bblk, T, H), lambda b, l: (b, 0, 0)),
                 pl.BlockSpec((bblk, T, S), lambda b, l: (b, 0, 0)))
    scratch_shapes = [
        pltpu.VMEM((R, H), jnp.float32),       # residual stream carried over layers
        pltpu.VMEM((R, VD), jnp.float32),      # per-head context slab
        pltpu.VMEM((R, 3 * H), jnp.float32),   # fused causal-conv #1 input
        pltpu.VMEM((R, 3 * F), jnp.float32),   # fused causal-conv #2 input
    ]

    # scoped-VMEM sizing: 2x (double buffer) every in/out block + scratch, with
    # headroom; capped at 64 MiB (v7x physical per-TC limit).
    est = sum(2 * int(np.prod(s.block_shape)) * a.dtype.itemsize
              for s, a in zip(in_specs, args))
    est += 2 * 4 * (bblk * T * H + bblk * T * S)
    est += 4 * R * (H + VD + 3 * H + 3 * F)
    vmem_limit = int(min(max(2 * est, 32 * 1024 * 1024), 64 * 1024 * 1024))

    kernel = partial(decoder_kernel, num_layers=L, num_heads=num_heads,
                     kdh=kdh, vdh=vdh, kd=KD, bblk=bblk,
                     key_scale=key_scale, cdt=cdt)
    y, attn = pl.pallas_call(
        kernel,
        out_shape=(jax.ShapeDtypeStruct((B, T, H), jnp.float32),
                   jax.ShapeDtypeStruct((B, T, S), jnp.float32)),
        grid=(nb, L),
        in_specs=in_specs,
        out_specs=out_specs,
        scratch_shapes=scratch_shapes,
        compiler_params=pltpu.CompilerParams(
            dimension_semantics=("parallel", "arbitrary"),
            vmem_limit_bytes=vmem_limit),
    )(*args)
    return y, attn


# ----------------------------------------------------------------------------
# parameters
# ----------------------------------------------------------------------------
def init_params(key, *, E, H, KD, VD, F, nh, L, max_length):
    keys = iter(jax.random.split(key, 16))

    def nrm(shape, scale=0.05):
        return jax.random.normal(next(keys), shape, jnp.float32) * scale

    return dict(
        emb_w=nrm((E, H)),                                   # embedding_proj (bias=False)
        ln_g=jnp.ones((1, H), jnp.float32), ln_b=jnp.zeros((1, H), jnp.float32),
        timing_signal=gen_timing_signal(max_length, H),
        subsequent_mask=gen_subsequent_mask(max_length),
        # attention weights packed (head h = column/row block h*d:(h+1)*d), stacked over L
        wq_s=nrm((L, H, KD)), wk_s=nrm((L, H, KD)), wv_s=nrm((L, H, VD)), wo_s=nrm((L, VD, H)),
        wq_c=nrm((L, H, KD)), wk_c=nrm((L, H, KD)), wv_c=nrm((L, H, VD)), wo_c=nrm((L, VD, H)),
        ln1_g=jnp.ones((L, 1, H), jnp.float32), ln1_b=jnp.zeros((L, 1, H), jnp.float32),
        ln2_g=jnp.ones((L, 1, H), jnp.float32), ln2_b=jnp.zeros((L, 1, H), jnp.float32),
        ln3_g=jnp.ones((L, 1, H), jnp.float32), ln3_b=jnp.zeros((L, 1, H), jnp.float32),
        # causal conv weights: tap k of layer l is index 3*l+k; tap 0->x[t-2], 2->x[t]
        c1_w=nrm((L * 3, H, F)), c1_b=jnp.zeros((L, 1, F), jnp.float32),
        c2_w=nrm((L * 3, F, H)), c2_b=jnp.zeros((L, 1, H), jnp.float32),
    )


# ----------------------------------------------------------------------------
# pure-JAX reference (same math, f32, no Pallas) for a correctness check
# ----------------------------------------------------------------------------
def reference_forward(params, inputs, encoder_output, mask, *, num_heads, total_key_depth):
    mask_src, mask_trg = mask
    B, T, E = inputs.shape
    nh = num_heads
    KD = params["wq_s"].shape[-1]
    VD = params["wv_s"].shape[-1]
    kdh, vdh = KD // nh, VD // nh
    L = params["wq_s"].shape[0]
    key_scale = (total_key_depth // num_heads) ** -0.5

    sub = params["subsequent_mask"][0, :T, :T]
    dmask = jnp.where((mask_trg.astype(jnp.int32) + sub[None]) > 0, -1e18, 0.0)  # [B,T,T]
    smask = jnp.where(mask_src, -1e18, 0.0)                                       # [B,1,S]

    def ln(v, g, b, eps=1e-6):
        m = jnp.mean(v, -1, keepdims=True)
        d = v - m
        var = jnp.sum(d * d, -1, keepdims=True) / (v.shape[-1] - 1)
        return g * d / (jnp.sqrt(var) + eps) + b

    def mha(q_in, kv_in, mask_add, wq, wk, wv, wo):
        q = (q_in @ wq) * key_scale
        k = kv_in @ wk
        v = kv_in @ wv
        Tq, Sk = q.shape[1], k.shape[1]
        qh = q.reshape(B, Tq, nh, kdh).transpose(0, 2, 1, 3)
        kh = k.reshape(B, Sk, nh, kdh).transpose(0, 2, 1, 3)
        vh = v.reshape(B, Sk, nh, vdh).transpose(0, 2, 1, 3)
        logits = jnp.einsum("bhqd,bhkd->bhqk", qh, kh) + mask_add[:, None]
        attn = jnp.sum(logits, axis=1) / nh
        w = jax.nn.softmax(logits, axis=-1)
        ctx = jnp.einsum("bhqk,bhkd->bhqd", w, vh).transpose(0, 2, 1, 3).reshape(B, Tq, nh * vdh)
        return ctx @ wo, attn

    def causal_conv(v, w, b):
        v1 = jnp.pad(v, ((0, 0), (1, 0), (0, 0)))[:, :-1]
        v2 = jnp.pad(v, ((0, 0), (2, 0), (0, 0)))[:, :-2]
        return v2 @ w[0] + v1 @ w[1] + v @ w[2] + b

    x = inputs @ params["emb_w"] + params["timing_signal"][:T][None]
    attn = None
    for l in range(L):
        xn = ln(x, params["ln1_g"][l], params["ln1_b"][l])
        ysa, _ = mha(xn, xn, dmask, params["wq_s"][l], params["wk_s"][l],
                     params["wv_s"][l], params["wo_s"][l])
        x = x + ysa
        xn = ln(x, params["ln2_g"][l], params["ln2_b"][l])
        yca, attn = mha(xn, encoder_output, smask, params["wq_c"][l], params["wk_c"][l],
                        params["wv_c"][l], params["wo_c"][l])
        x = x + yca
        xn = ln(x, params["ln3_g"][l], params["ln3_b"][l])
        h = jnp.maximum(causal_conv(xn, params["c1_w"][3 * l:3 * l + 3], params["c1_b"][l]), 0.0)
        h = jnp.maximum(causal_conv(h, params["c2_w"][3 * l:3 * l + 3], params["c2_b"][l]), 0.0)
        x = x + h
    y = ln(x, params["ln_g"], params["ln_b"])
    return y, attn


# ----------------------------------------------------------------------------
if __name__ == "__main__":
    B, T, S = 2, 8, 10
    E, H, F = 32, 32, 64
    nh, KD, VD, L = 4, 32, 32, 2
    MAX_LEN = 64

    key = jax.random.PRNGKey(0)
    k_inp, k_enc, k_par = jax.random.split(key, 3)
    inputs = jax.random.normal(k_inp, (B, T, E), jnp.float32)
    encoder_output = jax.random.normal(k_enc, (B, S, H), jnp.float32)

    # padding masks (True where padded), shapes as used by the reference model
    mask_src = jnp.zeros((B, 1, S), jnp.bool_).at[:, :, S - 2:].set(True)
    mask_trg = jnp.zeros((B, 1, T), jnp.bool_).at[:, :, T - 1:].set(True)

    params = init_params(k_par, E=E, H=H, KD=KD, VD=VD, F=F, nh=nh, L=L, max_length=MAX_LEN)

    y_expect, attn_expect = reference_forward(
        params, inputs, encoder_output, (mask_src, mask_trg),
        num_heads=nh, total_key_depth=KD,
    )

    # bblk=1: one sample per step (2 grid steps on the batch axis -> megacore);
    # bblk=2: multiple samples per step (amortizes per-step overhead on v5e/v6e).
    for bblk in (1, 2):
        y, attn_dist = decoder_forward(
            params, inputs, encoder_output, (mask_src, mask_trg),
            num_heads=nh, total_key_depth=KD, bblk=bblk,
        )
        jax.block_until_ready((y, attn_dist))
        assert y.shape == (B, T, H) and attn_dist.shape == (B, T, S)
        np.testing.assert_allclose(np.asarray(y), np.asarray(y_expect),
                                   rtol=5e-2, atol=2e-2)
        np.testing.assert_allclose(np.asarray(attn_dist), np.asarray(attn_expect),
                                   rtol=5e-2, atol=2e-2)

    print("KERNEL_OK")
</pallas_src>

<mosaic_0001>
module attributes {stable_mosaic.version = 11 : i64} {
  func.func @decoder_kernel(%arg0: i32, %arg1: i32, %arg2: memref<1x8x32xbf16, #tpu.memory_space<vmem>>, %arg3: memref<1x10x32xbf16, #tpu.memory_space<vmem>>, %arg4: memref<8x8xf32, #tpu.memory_space<vmem>>, %arg5: memref<1x1x8xf32, #tpu.memory_space<vmem>>, %arg6: memref<1x1x10xf32, #tpu.memory_space<vmem>>, %arg7: memref<32x32xbf16, #tpu.memory_space<vmem>>, %arg8: memref<8x32xf32, #tpu.memory_space<vmem>>, %arg9: memref<1x32x96xbf16, #tpu.memory_space<vmem>>, %arg10: memref<1x32x32xbf16, #tpu.memory_space<vmem>>, %arg11: memref<1x32x32xbf16, #tpu.memory_space<vmem>>, %arg12: memref<1x32x64xbf16, #tpu.memory_space<vmem>>, %arg13: memref<1x32x32xbf16, #tpu.memory_space<vmem>>, %arg14: memref<1x1x32xf32, #tpu.memory_space<vmem>>, %arg15: memref<1x1x32xf32, #tpu.memory_space<vmem>>, %arg16: memref<1x1x32xf32, #tpu.memory_space<vmem>>, %arg17: memref<1x1x32xf32, #tpu.memory_space<vmem>>, %arg18: memref<1x1x32xf32, #tpu.memory_space<vmem>>, %arg19: memref<1x1x32xf32, #tpu.memory_space<vmem>>, %arg20: memref<1x96x64xbf16, #tpu.memory_space<vmem>>, %arg21: memref<1x1x64xf32, #tpu.memory_space<vmem>>, %arg22: memref<1x192x32xbf16, #tpu.memory_space<vmem>>, %arg23: memref<1x1x32xf32, #tpu.memory_space<vmem>>, %arg24: memref<1x32xf32, #tpu.memory_space<vmem>>, %arg25: memref<1x32xf32, #tpu.memory_space<vmem>>, %arg26: memref<1x8x32xf32, #tpu.memory_space<vmem>>, %arg27: memref<1x8x10xf32, #tpu.memory_space<vmem>>, %arg28: memref<8x32xf32, #tpu.memory_space<vmem>>, %arg29: memref<8x32xf32, #tpu.memory_space<vmem>>, %arg30: memref<8x96xf32, #tpu.memory_space<vmem>>, %arg31: memref<8x192xf32, #tpu.memory_space<vmem>>) attributes {dimension_semantics = [#tpu.dimension_semantics<parallel>, #tpu.dimension_semantics<arbitrary>], iteration_bounds = array<i64: 2, 2>, scalar_prefetch = 0 : i64, scratch_operands = 4 : i64, tpu.core_type = #tpu.core_type<tc>, window_params = [{transform_indices = @transform_0, window_bounds = array<i64: 1, 8, 32>}, {transform_indices = @transform_1, window_bounds = array<i64: 1, 10, 32>}, {pipeline_mode = #tpu.pipeline_mode<synchronous>, transform_indices = @transform_2, window_bounds = array<i64: 8, 8>}, {transform_indices = @transform_3, window_bounds = array<i64: 1, 1, 8>}, {transform_indices = @transform_4, window_bounds = array<i64: 1, 1, 10>}, {pipeline_mode = #tpu.pipeline_mode<synchronous>, transform_indices = @transform_5, window_bounds = array<i64: 32, 32>}, {pipeline_mode = #tpu.pipeline_mode<synchronous>, transform_indices = @transform_6, window_bounds = array<i64: 8, 32>}, {transform_indices = @transform_7, window_bounds = array<i64: 1, 32, 96>}, {transform_indices = @transform_8, window_bounds = array<i64: 1, 32, 32>}, {transform_indices = @transform_9, window_bounds = array<i64: 1, 32, 32>}, {transform_indices = @transform_10, window_bounds = array<i64: 1, 32, 64>}, {transform_indices = @transform_11, window_bounds = array<i64: 1, 32, 32>}, {transform_indices = @transform_12, window_bounds = array<i64: 1, 1, 32>}, {transform_indices = @transform_13, window_bounds = array<i64: 1, 1, 32>}, {transform_indices = @transform_14, window_bounds = array<i64: 1, 1, 32>}, {transform_indices = @transform_15, window_bounds = array<i64: 1, 1, 32>}, {transform_indices = @transform_16, window_bounds = array<i64: 1, 1, 32>}, {transform_indices = @transform_17, window_bounds = array<i64: 1, 1, 32>}, {transform_indices = @transform_18, window_bounds = array<i64: 1, 96, 64>}, {transform_indices = @transform_19, window_bounds = array<i64: 1, 1, 64>}, {transform_indices = @transform_20, window_bounds = array<i64: 1, 192, 32>}, {transform_indices = @transform_21, window_bounds = array<i64: 1, 1, 32>}, {pipeline_mode = #tpu.pipeline_mode<synchronous>, transform_indices = @transform_22, window_bounds = array<i64: 1, 32>}, {pipeline_mode = #tpu.pipeline_mode<synchronous>, transform_indices = @transform_23, window_bounds = array<i64: 1, 32>}, {transform_indices = @transform_24, window_bounds = array<i64: 1, 8, 32>}, {transform_indices = @transform_25, window_bounds = array<i64: 1, 8, 10>}]} {
    %c0_i32 = arith.constant 0 : i32
    %0 = arith.cmpi eq, %arg1, %c0_i32 : i32
    %1 = arith.extui %0 : i1 to i32
    %c0_i32_0 = arith.constant 0 : i32
    %2 = arith.cmpi ne, %1, %c0_i32_0 : i32
    scf.if %2 {
      %c0_155 = arith.constant 0 : index
      %c0_156 = arith.constant 0 : index
      %c0_157 = arith.constant 0 : index
      %316 = vector.load %arg2[%c0_155, %c0_156, %c0_157] : memref<1x8x32xbf16, #tpu.memory_space<vmem>>, vector<1x8x32xbf16>
      %317 = vector.shape_cast %316 : vector<1x8x32xbf16> to vector<8x32xbf16>
      %c0_158 = arith.constant 0 : index
      %c0_159 = arith.constant 0 : index
      %318 = vector.load %arg7[%c0_158, %c0_159] : memref<32x32xbf16, #tpu.memory_space<vmem>>, vector<32x32xbf16>
      %cst_160 = arith.constant dense<0.000000e+00> : vector<8x32xf32>
      %319 = tpu.matmul %317, %318, %cst_160 {dimension_numbers = #tpu.dot_dimension_numbers<[1], [0], [0], [1], [0, 0, 1, 1], [], []>} : vector<8x32xbf16>, vector<32x32xbf16>, vector<8x32xf32> -> vector<8x32xf32>
      %c0_161 = arith.constant 0 : index
      %c0_162 = arith.constant 0 : index
      %320 = vector.load %arg8[%c0_161, %c0_162] : memref<8x32xf32, #tpu.memory_space<vmem>>, vector<8x32xf32>
      %321 = arith.addf %319, %320 : vector<8x32xf32>
      %c0_163 = arith.constant 0 : index
      %c0_164 = arith.constant 0 : index
      %322 = vector.load %arg28[%c0_163, %c0_164] : memref<8x32xf32, #tpu.memory_space<vmem>>, vector<8x32xf32>
      tpu.vector_store %arg28[%c0_163, %c0_164], %321 {strides = array<i32>} : memref<8x32xf32, #tpu.memory_space<vmem>>, vector<8x32xf32>,
    } else {
    }
    %c0 = arith.constant 0 : index
    %c0_1 = arith.constant 0 : index
    %3 = vector.load %arg28[%c0, %c0_1] : memref<8x32xf32, #tpu.memory_space<vmem>>, vector<8x32xf32>
    %4 = tpu.iota {dimensions = array<i32: 0>} : vector<8x1xi32>
    %c7_i32 = arith.constant 7 : i32
    %5 = vector.broadcast %c7_i32 : i32 to vector<8x1xi32>
    %6 = arith.andi %4, %5 : vector<8x1xi32>
    %c1_i32 = arith.constant 1 : i32
    %7 = vector.broadcast %c1_i32 : i32 to vector<8x1xi32>
    %8 = arith.cmpi sge, %6, %7 : vector<8x1xi32>
    %9 = arith.extui %8 : vector<8x1xi1> to vector<8x1xi32>
    %10 = arith.sitofp %9 : vector<8x1xi32> to vector<8x1xf32>
    %c2_i32 = arith.constant 2 : i32
    %11 = vector.broadcast %c2_i32 : i32 to vector<8x1xi32>
    %12 = arith.cmpi sge, %6, %11 : vector<8x1xi32>
    %13 = arith.extui %12 : vector<8x1xi1> to vector<8x1xi32>
    %14 = arith.sitofp %13 : vector<8x1xi32> to vector<8x1xf32>
    %c0_2 = arith.constant 0 : index
    %c0_3 = arith.constant 0 : index
    %c0_4 = arith.constant 0 : index
    %15 = vector.load %arg14[%c0_2, %c0_3, %c0_4] : memref<1x1x32xf32, #tpu.memory_space<vmem>>, vector<1x1x32xf32>
    %16 = vector.shape_cast %15 : vector<1x1x32xf32> to vector<1x32xf32>
    %c0_5 = arith.constant 0 : index
    %c0_6 = arith.constant 0 : index
    %c0_7 = arith.constant 0 : index
    %17 = vector.load %arg15[%c0_5, %c0_6, %c0_7] : memref<1x1x32xf32, #tpu.memory_space<vmem>>, vector<1x1x32xf32>
    %18 = vector.shape_cast %17 : vector<1x1x32xf32> to vector<1x32xf32>
    %cst = arith.constant dense<0.000000e+00> : vector<8xf32>
    %19 = vector.multi_reduction <add>, %3, %cst [1] : vector<8x32xf32> to vector<8xf32>
    %20 = vector.shape_cast %19 : vector<8xf32> to vector<8x1xf32>
    %cst_8 = arith.constant 3.200000e+01 : f32
    %21 = vector.broadcast %cst_8 : f32 to vector<8x1xf32>
    %22 = arith.divf %20, %21 : vector<8x1xf32>
    %23 = vector.broadcast %22 : vector<8x1xf32> to vector<8x32xf32>
    %24 = arith.subf %3, %23 : vector<8x32xf32>
    %25 = arith.mulf %24, %24 : vector<8x32xf32>
    %cst_9 = arith.constant dense<0.000000e+00> : vector<8xf32>
    %26 = vector.multi_reduction <add>, %25, %cst_9 [1] : vector<8x32xf32> to vector<8xf32>
    %27 = vector.shape_cast %26 : vector<8xf32> to vector<8x1xf32>
    %cst_10 = arith.constant 3.100000e+01 : f32
    %28 = vector.broadcast %cst_10 : f32 to vector<8x1xf32>
    %29 = arith.divf %27, %28 : vector<8x1xf32>
    %30 = vector.broadcast %16 : vector<1x32xf32> to vector<8x32xf32>
    %31 = arith.mulf %30, %24 : vector<8x32xf32>
    %32 = math.sqrt %29 : vector<8x1xf32>
    %cst_11 = arith.constant 9.99999997E-7 : f32
    %33 = vector.broadcast %cst_11 : f32 to vector<8x1xf32>
    %34 = arith.addf %32, %33 : vector<8x1xf32>
    %35 = vector.broadcast %34 : vector<8x1xf32> to vector<8x32xf32>
    %36 = arith.divf %31, %35 : vector<8x32xf32>
    %37 = vector.broadcast %18 : vector<1x32xf32> to vector<8x32xf32>
    %38 = arith.addf %36, %37 : vector<8x32xf32>
    %39 = arith.truncf %38 : vector<8x32xf32> to vector<8x32xbf16>
    %c0_12 = arith.constant 0 : index
    %c0_13 = arith.constant 0 : index
    %c0_14 = arith.constant 0 : index
    %40 = vector.load %arg9[%c0_12, %c0_13, %c0_14] : memref<1x32x96xbf16, #tpu.memory_space<vmem>>, vector<1x32x96xbf16>
    %41 = vector.shape_cast %40 : vector<1x32x96xbf16> to vector<32x96xbf16>
    %cst_15 = arith.constant dense<0.000000e+00> : vector<8x96xf32>
    %42 = tpu.matmul %39, %41, %cst_15 {dimension_numbers = #tpu.dot_dimension_numbers<[1], [0], [0], [1], [0, 0, 1, 1], [], []>} : vector<8x32xbf16>, vector<32x96xbf16>, vector<8x96xf32> -> vector<8x96xf32>
    %43 = vector.extract_strided_slice %42 {offsets = [0, 0], sizes = [8, 32], strides = [1, 1]} : vector<8x96xf32> to vector<8x32xf32>
    %cst_16 = arith.constant 0.353553385 : f32
    %44 = vector.broadcast %cst_16 : f32 to vector<8x32xf32>
    %45 = arith.mulf %43, %44 : vector<8x32xf32>
    %46 = vector.extract_strided_slice %42 {offsets = [0, 32], sizes = [8, 32], strides = [1, 1]} : vector<8x96xf32> to vector<8x32xf32>
    %47 = vector.extract_strided_slice %42 {offsets = [0, 64], sizes = [8, 32], strides = [1, 1]} : vector<8x96xf32> to vector<8x32xf32>
    %c0_17 = arith.constant 0 : index
    %c0_18 = arith.constant 0 : index
    %48 = vector.load %arg4[%c0_17, %c0_18] : memref<8x8xf32, #tpu.memory_space<vmem>>, vector<8x8xf32>
    %c0_19 = arith.constant 0 : index
    %c0_20 = arith.constant 0 : index
    %c0_21 = arith.constant 0 : index
    %49 = vector.load %arg5[%c0_19, %c0_20, %c0_21] : memref<1x1x8xf32, #tpu.memory_space<vmem>>, vector<1x1x8xf32>
    %50 = vector.shape_cast %49 : vector<1x1x8xf32> to vector<1x8xf32>
    %51 = vector.broadcast %50 : vector<1x8xf32> to vector<8x8xf32>
    %52 = arith.minimumf %48, %51 : vector<8x8xf32>
    %53 = vector.extract_strided_slice %45 {offsets = [0, 0], sizes = [8, 8], strides = [1, 1]} : vector<8x32xf32> to vector<8x8xf32>
    %54 = vector.extract_strided_slice %46 {offsets = [0, 0], sizes = [8, 8], strides = [1, 1]} : vector<8x32xf32> to vector<8x8xf32>
    %55 = vector.extract_strided_slice %47 {offsets = [0, 0], sizes = [8, 8], strides = [1, 1]} : vector<8x32xf32> to vector<8x8xf32>
    %cst_22 = arith.constant dense<0.000000e+00> : vector<8x8xf32>
    %56 = tpu.matmul %53, %54, %cst_22 {dimension_numbers = #tpu.dot_dimension_numbers<[1], [1], [0], [0], [0, 0, 1, 0], [], []>} : vector<8x8xf32>, vector<8x8xf32>, vector<8x8xf32> -> vector<8x8xf32>
    %57 = arith.addf %56, %52 : vector<8x8xf32>
    %cst_23 = arith.constant dense<0xFF800000> : vector<8xf32>
    %58 = vector.multi_reduction <maximumf>, %57, %cst_23 [1] : vector<8x8xf32> to vector<8xf32>
    %59 = vector.shape_cast %58 : vector<8xf32> to vector<8x1xf32>
    %60 = vector.broadcast %59 : vector<8x1xf32> to vector<8x8xf32>
    %61 = arith.subf %57, %60 : vector<8x8xf32>
    %62 = math.exp %61 : vector<8x8xf32>
    %cst_24 = arith.constant dense<0.000000e+00> : vector<8xf32>
    %63 = vector.multi_reduction <add>, %62, %cst_24 [1] : vector<8x8xf32> to vector<8xf32>
    %64 = vector.shape_cast %63 : vector<8xf32> to vector<8x1xf32>
    %65 = tpu.reciprocal %64 {approx = true} : vector<8x1xf32> -> vector<8x1xf32>
    %66 = vector.broadcast %65 : vector<8x1xf32> to vector<8x8xf32>
    %67 = arith.mulf %62, %66 : vector<8x8xf32>
    %cst_25 = arith.constant dense<0.000000e+00> : vector<8x8xf32>
    %68 = tpu.matmul %67, %55, %cst_25 {dimension_numbers = #tpu.dot_dimension_numbers<[1], [0], [0], [1], [0, 0, 1, 1], [], []>} : vector<8x8xf32>, vector<8x8xf32>, vector<8x8xf32> -> vector<8x8xf32>
    %c0_26 = arith.constant 0 : index
    %c0_27 = arith.constant 0 : index
    %69 = vector.load %arg29[%c0_26, %c0_27] : memref<8x32xf32, #tpu.memory_space<vmem>>, vector<8x8xf32>
    tpu.vector_store %arg29[%c0_26, %c0_27], %68 {strides = array<i32>} : memref<8x32xf32, #tpu.memory_space<vmem>>, vector<8x8xf32>,
    %70 = vector.extract_strided_slice %45 {offsets = [0, 8], sizes = [8, 8], strides = [1, 1]} : vector<8x32xf32> to vector<8x8xf32>
    %71 = vector.extract_strided_slice %46 {offsets = [0, 8], sizes = [8, 8], strides = [1, 1]} : vector<8x32xf32> to vector<8x8xf32>
    %72 = vector.extract_strided_slice %47 {offsets = [0, 8], sizes = [8, 8], strides = [1, 1]} : vector<8x32xf32> to vector<8x8xf32>
    %cst_28 = arith.constant dense<0.000000e+00> : vector<8x8xf32>
    %73 = tpu.matmul %70, %71, %cst_28 {dimension_numbers = #tpu.dot_dimension_numbers<[1], [1], [0], [0], [0, 0, 1, 0], [], []>} : vector<8x8xf32>, vector<8x8xf32>, vector<8x8xf32> -> vector<8x8xf32>
    %74 = arith.addf %73, %52 : vector<8x8xf32>
    %cst_29 = arith.constant dense<0xFF800000> : vector<8xf32>
    %75 = vector.multi_reduction <maximumf>, %74, %cst_29 [1] : vector<8x8xf32> to vector<8xf32>
    %76 = vector.shape_cast %75 : vector<8xf32> to vector<8x1xf32>
    %77 = vector.broadcast %76 : vector<8x1xf32> to vector<8x8xf32>
    %78 = arith.subf %74, %77 : vector<8x8xf32>
    %79 = math.exp %78 : vector<8x8xf32>
    %cst_30 = arith.constant dense<0.000000e+00> : vector<8xf32>
    %80 = vector.multi_reduction <add>, %79, %cst_30 [1] : vector<8x8xf32> to vector<8xf32>
    %81 = vector.shape_cast %80 : vector<8xf32> to vector<8x1xf32>
    %82 = tpu.reciprocal %81 {approx = true} : vector<8x1xf32> -> vector<8x1xf32>
    %83 = vector.broadcast %82 : vector<8x1xf32> to vector<8x8xf32>
    %84 = arith.mulf %79, %83 : vector<8x8xf32>
    %cst_31 = arith.constant dense<0.000000e+00> : vector<8x8xf32>
    %85 = tpu.matmul %84, %72, %cst_31 {dimension_numbers = #tpu.dot_dimension_numbers<[1], [0], [0], [1], [0, 0, 1, 1], [], []>} : vector<8x8xf32>, vector<8x8xf32>, vector<8x8xf32> -> vector<8x8xf32>
    %c0_32 = arith.constant 0 : index
    %c8 = arith.constant 8 : index
    %86 = vector.load %arg29[%c0_32, %c8] : memref<8x32xf32, #tpu.memory_space<vmem>>, vector<8x8xf32>
    tpu.vector_store %arg29[%c0_32, %c8], %85 {strides = array<i32>} : memref<8x32xf32, #tpu.memory_space<vmem>>, vector<8x8xf32>,
    %87 = vector.extract_strided_slice %45 {offsets = [0, 16], sizes = [8, 8], strides = [1, 1]} : vector<8x32xf32> to vector<8x8xf32>
    %88 = vector.extract_strided_slice %46 {offsets = [0, 16], sizes = [8, 8], strides = [1, 1]} : vector<8x32xf32> to vector<8x8xf32>
    %89 = vector.extract_strided_slice %47 {offsets = [0, 16], sizes = [8, 8], strides = [1, 1]} : vector<8x32xf32> to vector<8x8xf32>
    %cst_33 = arith.constant dense<0.000000e+00> : vector<8x8xf32>
    %90 = tpu.matmul %87, %88, %cst_33 {dimension_numbers = #tpu.dot_dimension_numbers<[1], [1], [0], [0], [0, 0, 1, 0], [], []>} : vector<8x8xf32>, vector<8x8xf32>, vector<8x8xf32> -> vector<8x8xf32>
    %91 = arith.addf %90, %52 : vector<8x8xf32>
    %cst_34 = arith.constant dense<0xFF800000> : vector<8xf32>
    %92 = vector.multi_reduction <maximumf>, %91, %cst_34 [1] : vector<8x8xf32> to vector<8xf32>
    %93 = vector.shape_cast %92 : vector<8xf32> to vector<8x1xf32>
    %94 = vector.broadcast %93 : vector<8x1xf32> to vector<8x8xf32>
    %95 = arith.subf %91, %94 : vector<8x8xf32>
    %96 = math.exp %95 : vector<8x8xf32>
    %cst_35 = arith.constant dense<0.000000e+00> : vector<8xf32>
    %97 = vector.multi_reduction <add>, %96, %cst_35 [1] : vector<8x8xf32> to vector<8xf32>
    %98 = vector.shape_cast %97 : vector<8xf32> to vector<8x1xf32>
    %99 = tpu.reciprocal %98 {approx = true} : vector<8x1xf32> -> vector<8x1xf32>
    %100 = vector.broadcast %99 : vector<8x1xf32> to vector<8x8xf32>
    %101 = arith.mulf %96, %100 : vector<8x8xf32>
    %cst_36 = arith.constant dense<0.000000e+00> : vector<8x8xf32>
    %102 = tpu.matmul %101, %89, %cst_36 {dimension_numbers = #tpu.dot_dimension_numbers<[1], [0], [0], [1], [0, 0, 1, 1], [], []>} : vector<8x8xf32>, vector<8x8xf32>, vector<8x8xf32> -> vector<8x8xf32>
    %c0_37 = arith.constant 0 : index
    %c16 = arith.constant 16 : index
    %103 = vector.load %arg29[%c0_37, %c16] : memref<8x32xf32, #tpu.memory_space<vmem>>, vector<8x8xf32>
    tpu.vector_store %arg29[%c0_37, %c16], %102 {strides = array<i32>} : memref<8x32xf32, #tpu.memory_space<vmem>>, vector<8x8xf32>,
    %104 = vector.extract_strided_slice %45 {offsets = [0, 24], sizes = [8, 8], strides = [1, 1]} : vector<8x32xf32> to vector<8x8xf32>
    %105 = vector.extract_strided_slice %46 {offsets = [0, 24], sizes = [8, 8], strides = [1, 1]} : vector<8x32xf32> to vector<8x8xf32>
    %106 = vector.extract_strided_slice %47 {offsets = [0, 24], sizes = [8, 8], strides = [1, 1]} : vector<8x32xf32> to vector<8x8xf32>
    %cst_38 = arith.constant dense<0.000000e+00> : vector<8x8xf32>
    %107 = tpu.matmul %104, %105, %cst_38 {dimension_numbers = #tpu.dot_dimension_numbers<[1], [1], [0], [0], [0, 0, 1, 0], [], []>} : vector<8x8xf32>, vector<8x8xf32>, vector<8x8xf32> -> vector<8x8xf32>
    %108 = arith.addf %107, %52 : vector<8x8xf32>
    %cst_39 = arith.constant dense<0xFF800000> : vector<8xf32>
    %109 = vector.multi_reduction <maximumf>, %108, %cst_39 [1] : vector<8x8xf32> to vector<8xf32>
    %110 = vector.shape_cast %109 : vector<8xf32> to vector<8x1xf32>
    %111 = vector.broadcast %110 : vector<8x1xf32> to vector<8x8xf32>
    %112 = arith.subf %108, %111 : vector<8x8xf32>
    %113 = math.exp %112 : vector<8x8xf32>
    %cst_40 = arith.constant dense<0.000000e+00> : vector<8xf32>
    %114 = vector.multi_reduction <add>, %113, %cst_40 [1] : vector<8x8xf32> to vector<8xf32>
    %115 = vector.shape_cast %114 : vector<8xf32> to vector<8x1xf32>
    %116 = tpu.reciprocal %115 {approx = true} : vector<8x1xf32> -> vector<8x1xf32>
    %117 = vector.broadcast %116 : vector<8x1xf32> to vector<8x8xf32>
    %118 = arith.mulf %113, %117 : vector<8x8xf32>
    %cst_41 = arith.constant dense<0.000000e+00> : vector<8x8xf32>
    %119 = tpu.matmul %118, %106, %cst_41 {dimension_numbers = #tpu.dot_dimension_numbers<[1], [0], [0], [1], [0, 0, 1, 1], [], []>} : vector<8x8xf32>, vector<8x8xf32>, vector<8x8xf32> -> vector<8x8xf32>
    %c0_42 = arith.constant 0 : index
    %c24 = arith.constant 24 : index
    %120 = vector.load %arg29[%c0_42, %c24] : memref<8x32xf32, #tpu.memory_space<vmem>>, vector<8x8xf32>
    tpu.vector_store %arg29[%c0_42, %c24], %119 {strides = array<i32>} : memref<8x32xf32, #tpu.memory_space<vmem>>, vector<8x8xf32>,
    %c0_43 = arith.constant 0 : index
    %c0_44 = arith.constant 0 : index
    %121 = vector.load %arg29[%c0_43, %c0_44] : memref<8x32xf32, #tpu.memory_space<vmem>>, vector<8x32xf32>
    %122 = arith.truncf %121 : vector<8x32xf32> to vector<8x32xbf16>
    %c0_45 = arith.constant 0 : index
    %c0_46 = arith.constant 0 : index
    %c0_47 = arith.constant 0 : index
    %123 = vector.load %arg10[%c0_45, %c0_46, %c0_47] : memref<1x32x32xbf16, #tpu.memory_space<vmem>>, vector<1x32x32xbf16>
    %124 = vector.shape_cast %123 : vector<1x32x32xbf16> to vector<32x32xbf16>
    %cst_48 = arith.constant dense<0.000000e+00> : vector<8x32xf32>
    %125 = tpu.matmul %122, %124, %cst_48 {dimension_numbers = #tpu.dot_dimension_numbers<[1], [0], [0], [1], [0, 0, 1, 1], [], []>} : vector<8x32xbf16>, vector<32x32xbf16>, vector<8x32xf32> -> vector<8x32xf32>
    %126 = arith.addf %3, %125 : vector<8x32xf32>
    %c0_49 = arith.constant 0 : index
    %c0_50 = arith.constant 0 : index
    %c0_51 = arith.constant 0 : index
    %127 = vector.load %arg16[%c0_49, %c0_50, %c0_51] : memref<1x1x32xf32, #tpu.memory_space<vmem>>, vector<1x1x32xf32>
    %128 = vector.shape_cast %127 : vector<1x1x32xf32> to vector<1x32xf32>
    %c0_52 = arith.constant 0 : index
    %c0_53 = arith.constant 0 : index
    %c0_54 = arith.constant 0 : index
    %129 = vector.load %arg17[%c0_52, %c0_53, %c0_54] : memref<1x1x32xf32, #tpu.memory_space<vmem>>, vector<1x1x32xf32>
    %130 = vector.shape_cast %129 : vector<1x1x32xf32> to vector<1x32xf32>
    %cst_55 = arith.constant dense<0.000000e+00> : vector<8xf32>
    %131 = vector.multi_reduction <add>, %126, %cst_55 [1] : vector<8x32xf32> to vector<8xf32>
    %132 = vector.shape_cast %131 : vector<8xf32> to vector<8x1xf32>
    %cst_56 = arith.constant 3.200000e+01 : f32
    %133 = vector.broadcast %cst_56 : f32 to vector<8x1xf32>
    %134 = arith.divf %132, %133 : vector<8x1xf32>
    %135 = vector.broadcast %134 : vector<8x1xf32> to vector<8x32xf32>
    %136 = arith.subf %126, %135 : vector<8x32xf32>
    %137 = arith.mulf %136, %136 : vector<8x32xf32>
    %cst_57 = arith.constant dense<0.000000e+00> : vector<8xf32>
    %138 = vector.multi_reduction <add>, %137, %cst_57 [1] : vector<8x32xf32> to vector<8xf32>
    %139 = vector.shape_cast %138 : vector<8xf32> to vector<8x1xf32>
    %cst_58 = arith.constant 3.100000e+01 : f32
    %140 = vector.broadcast %cst_58 : f32 to vector<8x1xf32>
    %141 = arith.divf %139, %140 : vector<8x1xf32>
    %142 = vector.broadcast %128 : vector<1x32xf32> to vector<8x32xf32>
    %143 = arith.mulf %142, %136 : vector<8x32xf32>
    %144 = math.sqrt %141 : vector<8x1xf32>
    %cst_59 = arith.constant 9.99999997E-7 : f32
    %145 = vector.broadcast %cst_59 : f32 to vector<8x1xf32>
    %146 = arith.addf %144, %145 : vector<8x1xf32>
    %147 = vector.broadcast %146 : vector<8x1xf32> to vector<8x32xf32>
    %148 = arith.divf %143, %147 : vector<8x32xf32>
    %149 = vector.broadcast %130 : vector<1x32xf32> to vector<8x32xf32>
    %150 = arith.addf %148, %149 : vector<8x32xf32>
    %151 = arith.truncf %150 : vector<8x32xf32> to vector<8x32xbf16>
    %c0_60 = arith.constant 0 : index
    %c0_61 = arith.constant 0 : index
    %c0_62 = arith.constant 0 : index
    %152 = vector.load %arg11[%c0_60, %c0_61, %c0_62] : memref<1x32x32xbf16, #tpu.memory_space<vmem>>, vector<1x32x32xbf16>
    %153 = vector.shape_cast %152 : vector<1x32x32xbf16> to vector<32x32xbf16>
    %cst_63 = arith.constant dense<0.000000e+00> : vector<8x32xf32>
    %154 = tpu.matmul %151, %153, %cst_63 {dimension_numbers = #tpu.dot_dimension_numbers<[1], [0], [0], [1], [0, 0, 1, 1], [], []>} : vector<8x32xbf16>, vector<32x32xbf16>, vector<8x32xf32> -> vector<8x32xf32>
    %cst_64 = arith.constant 0.353553385 : f32
    %155 = vector.broadcast %cst_64 : f32 to vector<8x32xf32>
    %156 = arith.mulf %154, %155 : vector<8x32xf32>
    %c0_65 = arith.constant 0 : index
    %c0_66 = arith.constant 0 : index
    %c0_67 = arith.constant 0 : index
    %157 = vector.load %arg3[%c0_65, %c0_66, %c0_67] : memref<1x10x32xbf16, #tpu.memory_space<vmem>>, vector<1x10x32xbf16>
    %158 = vector.shape_cast %157 : vector<1x10x32xbf16> to vector<10x32xbf16>
    %c0_68 = arith.constant 0 : index
    %c0_69 = arith.constant 0 : index
    %c0_70 = arith.constant 0 : index
    %159 = vector.load %arg12[%c0_68, %c0_69, %c0_70] : memref<1x32x64xbf16, #tpu.memory_space<vmem>>, vector<1x32x64xbf16>
    %160 = vector.shape_cast %159 : vector<1x32x64xbf16> to vector<32x64xbf16>
    %cst_71 = arith.constant dense<0.000000e+00> : vector<10x64xf32>
    %161 = tpu.matmul %158, %160, %cst_71 {dimension_numbers = #tpu.dot_dimension_numbers<[1], [0], [0], [1], [0, 0, 1, 1], [], []>} : vector<10x32xbf16>, vector<32x64xbf16>, vector<10x64xf32> -> vector<10x64xf32>
    %162 = vector.extract_strided_slice %161 {offsets = [0, 0], sizes = [10, 32], strides = [1, 1]} : vector<10x64xf32> to vector<10x32xf32>
    %163 = vector.extract_strided_slice %161 {offsets = [0, 32], sizes = [10, 32], strides = [1, 1]} : vector<10x64xf32> to vector<10x32xf32>
    %c0_72 = arith.constant 0 : index
    %c0_73 = arith.constant 0 : index
    %c0_74 = arith.constant 0 : index
    %164 = vector.load %arg6[%c0_72, %c0_73, %c0_74] : memref<1x1x10xf32, #tpu.memory_space<vmem>>, vector<1x1x10xf32>
    %165 = vector.shape_cast %164 : vector<1x1x10xf32> to vector<1x10xf32>
    %166 = vector.extract_strided_slice %156 {offsets = [0, 0], sizes = [8, 8], strides = [1, 1]} : vector<8x32xf32> to vector<8x8xf32>
    %167 = vector.extract_strided_slice %162 {offsets = [0, 0], sizes = [10, 8], strides = [1, 1]} : vector<10x32xf32> to vector<10x8xf32>
    %168 = vector.extract_strided_slice %163 {offsets = [0, 0], sizes = [10, 8], strides = [1, 1]} : vector<10x32xf32> to vector<10x8xf32>
    %cst_75 = arith.constant dense<0.000000e+00> : vector<8x10xf32>
    %169 = tpu.matmul %166, %167, %cst_75 {dimension_numbers = #tpu.dot_dimension_numbers<[1], [1], [0], [0], [0, 0, 1, 0], [], []>} : vector<8x8xf32>, vector<10x8xf32>, vector<8x10xf32> -> vector<8x10xf32>
    %170 = vector.broadcast %165 : vector<1x10xf32> to vector<8x10xf32>
    %171 = arith.addf %169, %170 : vector<8x10xf32>
    %cst_76 = arith.constant dense<0xFF800000> : vector<8xf32>
    %172 = vector.multi_reduction <maximumf>, %171, %cst_76 [1] : vector<8x10xf32> to vector<8xf32>
    %173 = vector.shape_cast %172 : vector<8xf32> to vector<8x1xf32>
    %174 = vector.broadcast %173 : vector<8x1xf32> to vector<8x10xf32>
    %175 = arith.subf %171, %174 : vector<8x10xf32>
    %176 = math.exp %175 : vector<8x10xf32>
    %cst_77 = arith.constant dense<0.000000e+00> : vector<8xf32>
    %177 = vector.multi_reduction <add>, %176, %cst_77 [1] : vector<8x10xf32> to vector<8xf32>
    %178 = vector.shape_cast %177 : vector<8xf32> to vector<8x1xf32>
    %179 = tpu.reciprocal %178 {approx = true} : vector<8x1xf32> -> vector<8x1xf32>
    %180 = vector.broadcast %179 : vector<8x1xf32> to vector<8x10xf32>
    %181 = arith.mulf %176, %180 : vector<8x10xf32>
    %cst_78 = arith.constant dense<0.000000e+00> : vector<8x8xf32>
    %182 = tpu.matmul %181, %168, %cst_78 {dimension_numbers = #tpu.dot_dimension_numbers<[1], [0], [0], [1], [0, 0, 1, 1], [], []>} : vector<8x10xf32>, vector<10x8xf32>, vector<8x8xf32> -> vector<8x8xf32>
    %c0_79 = arith.constant 0 : index
    %c0_80 = arith.constant 0 : index
    %183 = vector.load %arg29[%c0_79, %c0_80] : memref<8x32xf32, #tpu.memory_space<vmem>>, vector<8x8xf32>
    tpu.vector_store %arg29[%c0_79, %c0_80], %182 {strides = array<i32>} : memref<8x32xf32, #tpu.memory_space<vmem>>, vector<8x8xf32>,
    %184 = vector.extract_strided_slice %156 {offsets = [0, 8], sizes = [8, 8], strides = [1, 1]} : vector<8x32xf32> to vector<8x8xf32>
    %185 = vector.extract_strided_slice %162 {offsets = [0, 8], sizes = [10, 8], strides = [1, 1]} : vector<10x32xf32> to vector<10x8xf32>
    %186 = vector.extract_strided_slice %163 {offsets = [0, 8], sizes = [10, 8], strides = [1, 1]} : vector<10x32xf32> to vector<10x8xf32>
    %cst_81 = arith.constant dense<0.000000e+00> : vector<8x10xf32>
    %187 = tpu.matmul %184, %185, %cst_81 {dimension_numbers = #tpu.dot_dimension_numbers<[1], [1], [0], [0], [0, 0, 1, 0], [], []>} : vector<8x8xf32>, vector<10x8xf32>, vector<8x10xf32> -> vector<8x10xf32>
    %188 = vector.broadcast %165 : vector<1x10xf32> to vector<8x10xf32>
    %189 = arith.addf %187, %188 : vector<8x10xf32>
    %cst_82 = arith.constant dense<0xFF800000> : vector<8xf32>
    %190 = vector.multi_reduction <maximumf>, %189, %cst_82 [1] : vector<8x10xf32> to vector<8xf32>
    %191 = vector.shape_cast %190 : vector<8xf32> to vector<8x1xf32>
    %192 = vector.broadcast %191 : vector<8x1xf32> to vector<8x10xf32>
    %193 = arith.subf %189, %192 : vector<8x10xf32>
    %194 = math.exp %193 : vector<8x10xf32>
    %cst_83 = arith.constant dense<0.000000e+00> : vector<8xf32>
    %195 = vector.multi_reduction <add>, %194, %cst_83 [1] : vector<8x10xf32> to vector<8xf32>
    %196 = vector.shape_cast %195 : vector<8xf32> to vector<8x1xf32>
    %197 = tpu.reciprocal %196 {approx = true} : vector<8x1xf32> -> vector<8x1xf32>
    %198 = vector.broadcast %197 : vector<8x1xf32> to vector<8x10xf32>
    %199 = arith.mulf %194, %198 : vector<8x10xf32>
    %cst_84 = arith.constant dense<0.000000e+00> : vector<8x8xf32>
    %200 = tpu.matmul %199, %186, %cst_84 {dimension_numbers = #tpu.dot_dimension_numbers<[1], [0], [0], [1], [0, 0, 1, 1], [], []>} : vector<8x10xf32>, vector<10x8xf32>, vector<8x8xf32> -> vector<8x8xf32>
    %c0_85 = arith.constant 0 : index
    %c8_86 = arith.constant 8 : index
    %201 = vector.load %arg29[%c0_85, %c8_86] : memref<8x32xf32, #tpu.memory_space<vmem>>, vector<8x8xf32>
    tpu.vector_store %arg29[%c0_85, %c8_86], %200 {strides = array<i32>} : memref<8x32xf32, #tpu.memory_space<vmem>>, vector<8x8xf32>,
    %202 = vector.extract_strided_slice %156 {offsets = [0, 16], sizes = [8, 8], strides = [1, 1]} : vector<8x32xf32> to vector<8x8xf32>
    %203 = vector.extract_strided_slice %162 {offsets = [0, 16], sizes = [10, 8], strides = [1, 1]} : vector<10x32xf32> to vector<10x8xf32>
    %204 = vector.extract_strided_slice %163 {offsets = [0, 16], sizes = [10, 8], strides = [1, 1]} : vector<10x32xf32> to vector<10x8xf32>
    %cst_87 = arith.constant dense<0.000000e+00> : vector<8x10xf32>
    %205 = tpu.matmul %202, %203, %cst_87 {dimension_numbers = #tpu.dot_dimension_numbers<[1], [1], [0], [0], [0, 0, 1, 0], [], []>} : vector<8x8xf32>, vector<10x8xf32>, vector<8x10xf32> -> vector<8x10xf32>
    %206 = vector.broadcast %165 : vector<1x10xf32> to vector<8x10xf32>
    %207 = arith.addf %205, %206 : vector<8x10xf32>
    %cst_88 = arith.constant dense<0xFF800000> : vector<8xf32>
    %208 = vector.multi_reduction <maximumf>, %207, %cst_88 [1] : vector<8x10xf32> to vector<8xf32>
    %209 = vector.shape_cast %208 : vector<8xf32> to vector<8x1xf32>
    %210 = vector.broadcast %209 : vector<8x1xf32> to vector<8x10xf32>
    %211 = arith.subf %207, %210 : vector<8x10xf32>
    %212 = math.exp %211 : vector<8x10xf32>
    %cst_89 = arith.constant dense<0.000000e+00> : vector<8xf32>
    %213 = vector.multi_reduction <add>, %212, %cst_89 [1] : vector<8x10xf32> to vector<8xf32>
    %214 = vector.shape_cast %213 : vector<8xf32> to vector<8x1xf32>
    %215 = tpu.reciprocal %214 {approx = true} : vector<8x1xf32> -> vector<8x1xf32>
    %216 = vector.broadcast %215 : vector<8x1xf32> to vector<8x10xf32>
    %217 = arith.mulf %212, %216 : vector<8x10xf32>
    %cst_90 = arith.constant dense<0.000000e+00> : vector<8x8xf32>
    %218 = tpu.matmul %217, %204, %cst_90 {dimension_numbers = #tpu.dot_dimension_numbers<[1], [0], [0], [1], [0, 0, 1, 1], [], []>} : vector<8x10xf32>, vector<10x8xf32>, vector<8x8xf32> -> vector<8x8xf32>
    %c0_91 = arith.constant 0 : index
    %c16_92 = arith.constant 16 : index
    %219 = vector.load %arg29[%c0_91, %c16_92] : memref<8x32xf32, #tpu.memory_space<vmem>>, vector<8x8xf32>
    tpu.vector_store %arg29[%c0_91, %c16_92], %218 {strides = array<i32>} : memref<8x32xf32, #tpu.memory_space<vmem>>, vector<8x8xf32>,
    %220 = vector.extract_strided_slice %156 {offsets = [0, 24], sizes = [8, 8], strides = [1, 1]} : vector<8x32xf32> to vector<8x8xf32>
    %221 = vector.extract_strided_slice %162 {offsets = [0, 24], sizes = [10, 8], strides = [1, 1]} : vector<10x32xf32> to vector<10x8xf32>
    %222 = vector.extract_strided_slice %163 {offsets = [0, 24], sizes = [10, 8], strides = [1, 1]} : vector<10x32xf32> to vector<10x8xf32>
    %cst_93 = arith.constant dense<0.000000e+00> : vector<8x10xf32>
    %223 = tpu.matmul %220, %221, %cst_93 {dimension_numbers = #tpu.dot_dimension_numbers<[1], [1], [0], [0], [0, 0, 1, 0], [], []>} : vector<8x8xf32>, vector<10x8xf32>, vector<8x10xf32> -> vector<8x10xf32>
    %224 = vector.broadcast %165 : vector<1x10xf32> to vector<8x10xf32>
    %225 = arith.addf %223, %224 : vector<8x10xf32>
    %cst_94 = arith.constant dense<0xFF800000> : vector<8xf32>
    %226 = vector.multi_reduction <maximumf>, %225, %cst_94 [1] : vector<8x10xf32> to vector<8xf32>
    %227 = vector.shape_cast %226 : vector<8xf32> to vector<8x1xf32>
    %228 = vector.broadcast %227 : vector<8x1xf32> to vector<8x10xf32>
    %229 = arith.subf %225, %228 : vector<8x10xf32>
    %230 = math.exp %229 : vector<8x10xf32>
    %cst_95 = arith.constant dense<0.000000e+00> : vector<8xf32>
    %231 = vector.multi_reduction <add>, %230, %cst_95 [1] : vector<8x10xf32> to vector<8xf32>
    %232 = vector.shape_cast %231 : vector<8xf32> to vector<8x1xf32>
    %233 = tpu.reciprocal %232 {approx = true} : vector<8x1xf32> -> vector<8x1xf32>
    %234 = vector.broadcast %233 : vector<8x1xf32> to vector<8x10xf32>
    %235 = arith.mulf %230, %234 : vector<8x10xf32>
    %cst_96 = arith.constant dense<0.000000e+00> : vector<8x8xf32>
    %236 = tpu.matmul %235, %222, %cst_96 {dimension_numbers = #tpu.dot_dimension_numbers<[1], [0], [0], [1], [0, 0, 1, 1], [], []>} : vector<8x10xf32>, vector<10x8xf32>, vector<8x8xf32> -> vector<8x8xf32>
    %c0_97 = arith.constant 0 : index
    %c24_98 = arith.constant 24 : index
    %237 = vector.load %arg29[%c0_97, %c24_98] : memref<8x32xf32, #tpu.memory_space<vmem>>, vector<8x8xf32>
    tpu.vector_store %arg29[%c0_97, %c24_98], %236 {strides = array<i32>} : memref<8x32xf32, #tpu.memory_space<vmem>>, vector<8x8xf32>,
    %c1_i32_99 = arith.constant 1 : i32
    %238 = arith.cmpi eq, %arg1, %c1_i32_99 : i32
    %239 = arith.extui %238 : i1 to i32
    %c0_i32_100 = arith.constant 0 : i32
    %240 = arith.cmpi ne, %239, %c0_i32_100 : i32
    scf.if %240 {
      %cst_155 = arith.constant dense<0.000000e+00> : vector<8x10xf32>
      %316 = tpu.matmul %156, %162, %cst_155 {dimension_numbers = #tpu.dot_dimension_numbers<[1], [1], [0], [0], [0, 0, 1, 0], [], []>} : vector<8x32xf32>, vector<10x32xf32>, vector<8x10xf32> -> vector<8x10xf32>
      %cst_156 = arith.constant 2.500000e-01 : f32
      %317 = vector.broadcast %cst_156 : f32 to vector<8x10xf32>
      %318 = arith.mulf %316, %317 : vector<8x10xf32>
      %319 = vector.broadcast %165 : vector<1x10xf32> to vector<8x10xf32>
      %320 = arith.addf %318, %319 : vector<8x10xf32>
      %c0_157 = arith.constant 0 : index
      %c0_158 = arith.constant 0 : index
      %c0_159 = arith.constant 0 : index
      %321 = vector.load %arg27[%c0_157, %c0_158, %c0_159] : memref<1x8x10xf32, #tpu.memory_space<vmem>>, vector<1x8x10xf32>
      %322 = vector.shape_cast %321 : vector<1x8x10xf32> to vector<8x10xf32>
      %323 = vector.shape_cast %320 : vector<8x10xf32> to vector<1x8x10xf32>
      tpu.vector_store %arg27[%c0_157, %c0_158, %c0_159], %323 {strides = array<i32>} : memref<1x8x10xf32, #tpu.memory_space<vmem>>, vector<1x8x10xf32>,
    } else {
    }
    %c0_101 = arith.constant 0 : index
    %c0_102 = arith.constant 0 : index
    %241 = vector.load %arg29[%c0_101, %c0_102] : memref<8x32xf32, #tpu.memory_space<vmem>>, vector<8x32xf32>
    %242 = arith.truncf %241 : vector<8x32xf32> to vector<8x32xbf16>
    %c0_103 = arith.constant 0 : index
    %c0_104 = arith.constant 0 : index
    %c0_105 = arith.constant 0 : index
    %243 = vector.load %arg13[%c0_103, %c0_104, %c0_105] : memref<1x32x32xbf16, #tpu.memory_space<vmem>>, vector<1x32x32xbf16>
    %244 = vector.shape_cast %243 : vector<1x32x32xbf16> to vector<32x32xbf16>
    %cst_106 = arith.constant dense<0.000000e+00> : vector<8x32xf32>
    %245 = tpu.matmul %242, %244, %cst_106 {dimension_numbers = #tpu.dot_dimension_numbers<[1], [0], [0], [1], [0, 0, 1, 1], [], []>} : vector<8x32xbf16>, vector<32x32xbf16>, vector<8x32xf32> -> vector<8x32xf32>
    %246 = arith.addf %126, %245 : vector<8x32xf32>
    %c0_107 = arith.constant 0 : index
    %c0_108 = arith.constant 0 : index
    %c0_109 = arith.constant 0 : index
    %247 = vector.load %arg18[%c0_107, %c0_108, %c0_109] : memref<1x1x32xf32, #tpu.memory_space<vmem>>, vector<1x1x32xf32>
    %248 = vector.shape_cast %247 : vector<1x1x32xf32> to vector<1x32xf32>
    %c0_110 = arith.constant 0 : index
    %c0_111 = arith.constant 0 : index
    %c0_112 = arith.constant 0 : index
    %249 = vector.load %arg19[%c0_110, %c0_111, %c0_112] : memref<1x1x32xf32, #tpu.memory_space<vmem>>, vector<1x1x32xf32>
    %250 = vector.shape_cast %249 : vector<1x1x32xf32> to vector<1x32xf32>
    %cst_113 = arith.constant dense<0.000000e+00> : vector<8xf32>
    %251 = vector.multi_reduction <add>, %246, %cst_113 [1] : vector<8x32xf32> to vector<8xf32>
    %252 = vector.shape_cast %251 : vector<8xf32> to vector<8x1xf32>
    %cst_114 = arith.constant 3.200000e+01 : f32
    %253 = vector.broadcast %cst_114 : f32 to vector<8x1xf32>
    %254 = arith.divf %252, %253 : vector<8x1xf32>
    %255 = vector.broadcast %254 : vector<8x1xf32> to vector<8x32xf32>
    %256 = arith.subf %246, %255 : vector<8x32xf32>
    %257 = arith.mulf %256, %256 : vector<8x32xf32>
    %cst_115 = arith.constant dense<0.000000e+00> : vector<8xf32>
    %258 = vector.multi_reduction <add>, %257, %cst_115 [1] : vector<8x32xf32> to vector<8xf32>
    %259 = vector.shape_cast %258 : vector<8xf32> to vector<8x1xf32>
    %cst_116 = arith.constant 3.100000e+01 : f32
    %260 = vector.broadcast %cst_116 : f32 to vector<8x1xf32>
    %261 = arith.divf %259, %260 : vector<8x1xf32>
    %262 = vector.broadcast %248 : vector<1x32xf32> to vector<8x32xf32>
    %263 = arith.mulf %262, %256 : vector<8x32xf32>
    %264 = math.sqrt %261 : vector<8x1xf32>
    %cst_117 = arith.constant 9.99999997E-7 : f32
    %265 = vector.broadcast %cst_117 : f32 to vector<8x1xf32>
    %266 = arith.addf %264, %265 : vector<8x1xf32>
    %267 = vector.broadcast %266 : vector<8x1xf32> to vector<8x32xf32>
    %268 = arith.divf %263, %267 : vector<8x32xf32>
    %269 = vector.broadcast %250 : vector<1x32xf32> to vector<8x32xf32>
    %270 = arith.addf %268, %269 : vector<8x32xf32>
    %c0_118 = arith.constant 0 : index
    %c0_119 = arith.constant 0 : index
    %271 = vector.load %arg30[%c0_118, %c0_119] : memref<8x96xf32, #tpu.memory_space<vmem>>, vector<8x32xf32>
    tpu.vector_store %arg30[%c0_118, %c0_119], %270 {strides = array<i32>} : memref<8x96xf32, #tpu.memory_space<vmem>>, vector<8x32xf32>,
    %c1_i32_120 = arith.constant 1 : i32
    %272 = tpu.dynamic_rotate %270 by %c1_i32_120 dim 0 : vector<8x32xf32>, i32 -> vector<8x32xf32>
    %273 = vector.broadcast %10 : vector<8x1xf32> to vector<8x32xf32>
    %274 = arith.mulf %272, %273 : vector<8x32xf32>
    %c0_121 = arith.constant 0 : index
    %c32 = arith.constant 32 : index
    %275 = vector.load %arg30[%c0_121, %c32] : memref<8x96xf32, #tpu.memory_space<vmem>>, vector<8x32xf32>
    tpu.vector_store %arg30[%c0_121, %c32], %274 {strides = array<i32>} : memref<8x96xf32, #tpu.memory_space<vmem>>, vector<8x32xf32>,
    %c2_i32_122 = arith.constant 2 : i32
    %276 = tpu.dynamic_rotate %270 by %c2_i32_122 dim 0 : vector<8x32xf32>, i32 -> vector<8x32xf32>
    %277 = vector.broadcast %14 : vector<8x1xf32> to vector<8x32xf32>
    %278 = arith.mulf %276, %277 : vector<8x32xf32>
    %c0_123 = arith.constant 0 : index
    %c64 = arith.constant 64 : index
    %279 = vector.load %arg30[%c0_123, %c64] : memref<8x96xf32, #tpu.memory_space<vmem>>, vector<8x32xf32>
    tpu.vector_store %arg30[%c0_123, %c64], %278 {strides = array<i32>} : memref<8x96xf32, #tpu.memory_space<vmem>>, vector<8x32xf32>,
    %c0_124 = arith.constant 0 : index
    %c0_125 = arith.constant 0 : index
    %280 = vector.load %arg30[%c0_124, %c0_125] : memref<8x96xf32, #tpu.memory_space<vmem>>, vector<8x96xf32>
    %281 = arith.truncf %280 : vector<8x96xf32> to vector<8x96xbf16>
    %c0_126 = arith.constant 0 : index
    %c0_127 = arith.constant 0 : index
    %c0_128 = arith.constant 0 : index
    %282 = vector.load %arg20[%c0_126, %c0_127, %c0_128] : memref<1x96x64xbf16, #tpu.memory_space<vmem>>, vector<1x96x64xbf16>
    %283 = vector.shape_cast %282 : vector<1x96x64xbf16> to vector<96x64xbf16>
    %cst_129 = arith.constant dense<0.000000e+00> : vector<8x64xf32>
    %284 = tpu.matmul %281, %283, %cst_129 {dimension_numbers = #tpu.dot_dimension_numbers<[1], [0], [0], [1], [0, 0, 1, 1], [], []>} : vector<8x96xbf16>, vector<96x64xbf16>, vector<8x64xf32> -> vector<8x64xf32>
    %c0_130 = arith.constant 0 : index
    %c0_131 = arith.constant 0 : index
    %c0_132 = arith.constant 0 : index
    %285 = vector.load %arg21[%c0_130, %c0_131, %c0_132] : memref<1x1x64xf32, #tpu.memory_space<vmem>>, vector<1x1x64xf32>
    %286 = vector.shape_cast %285 : vector<1x1x64xf32> to vector<1x64xf32>
    %287 = vector.broadcast %286 : vector<1x64xf32> to vector<8x64xf32>
    %288 = arith.addf %284, %287 : vector<8x64xf32>
    %cst_133 = arith.constant 0.000000e+00 : f32
    %289 = vector.broadcast %cst_133 : f32 to vector<8x64xf32>
    %290 = arith.maximumf %288, %289 : vector<8x64xf32>
    %c0_134 = arith.constant 0 : index
    %c0_135 = arith.constant 0 : index
    %291 = vector.load %arg31[%c0_134, %c0_135] : memref<8x192xf32, #tpu.memory_space<vmem>>, vector<8x64xf32>
    tpu.vector_store %arg31[%c0_134, %c0_135], %290 {strides = array<i32>} : memref<8x192xf32, #tpu.memory_space<vmem>>, vector<8x64xf32>,
    %c1_i32_136 = arith.constant 1 : i32
    %292 = tpu.dynamic_rotate %290 by %c1_i32_136 dim 0 : vector<8x64xf32>, i32 -> vector<8x64xf32>
    %293 = vector.broadcast %10 : vector<8x1xf32> to vector<8x64xf32>
    %294 = arith.mulf %292, %293 : vector<8x64xf32>
    %c0_137 = arith.constant 0 : index
    %c64_138 = arith.constant 64 : index
    %295 = vector.load %arg31[%c0_137, %c64_138] : memref<8x192xf32, #tpu.memory_space<vmem>>, vector<8x64xf32>
    tpu.vector_store %arg31[%c0_137, %c64_138], %294 {strides = array<i32>} : memref<8x192xf32, #tpu.memory_space<vmem>>, vector<8x64xf32>,
    %c2_i32_139 = arith.constant 2 : i32
    %296 = tpu.dynamic_rotate %290 by %c2_i32_139 dim 0 : vector<8x64xf32>, i32 -> vector<8x64xf32>
    %297 = vector.broadcast %14 : vector<8x1xf32> to vector<8x64xf32>
    %298 = arith.mulf %296, %297 : vector<8x64xf32>
    %c0_140 = arith.constant 0 : index
    %c128 = arith.constant 128 : index
    %299 = vector.load %arg31[%c0_140, %c128] : memref<8x192xf32, #tpu.memory_space<vmem>>, vector<8x64xf32>
    tpu.vector_store %arg31[%c0_140, %c128], %298 {strides = array<i32>} : memref<8x192xf32, #tpu.memory_space<vmem>>, vector<8x64xf32>,
    %c0_141 = arith.constant 0 : index
    %c0_142 = arith.constant 0 : index
    %300 = vector.load %arg31[%c0_141, %c0_142] : memref<8x192xf32, #tpu.memory_space<vmem>>, vector<8x192xf32>
    %301 = arith.truncf %300 : vector<8x192xf32> to vector<8x192xbf16>
    %c0_143 = arith.constant 0 : index
    %c0_144 = arith.constant 0 : index
    %c0_145 = arith.constant 0 : index
    %302 = vector.load %arg22[%c0_143, %c0_144, %c0_145] : memref<1x192x32xbf16, #tpu.memory_space<vmem>>, vector<1x192x32xbf16>
    %303 = vector.shape_cast %302 : vector<1x192x32xbf16> to vector<192x32xbf16>
    %cst_146 = arith.constant dense<0.000000e+00> : vector<8x32xf32>
    %304 = tpu.matmul %301, %303, %cst_146 {dimension_numbers = #tpu.dot_dimension_numbers<[1], [0], [0], [1], [0, 0, 1, 1], [], []>} : vector<8x192xbf16>, vector<192x32xbf16>, vector<8x32xf32> -> vector<8x32xf32>
    %c0_147 = arith.constant 0 : index
    %c0_148 = arith.constant 0 : index
    %c0_149 = arith.constant 0 : index
    %305 = vector.load %arg23[%c0_147, %c0_148, %c0_149] : memref<1x1x32xf32, #tpu.memory_space<vmem>>, vector<1x1x32xf32>
    %306 = vector.shape_cast %305 : vector<1x1x32xf32> to vector<1x32xf32>
    %307 = vector.broadcast %306 : vector<1x32xf32> to vector<8x32xf32>
    %308 = arith.addf %304, %307 : vector<8x32xf32>
    %cst_150 = arith.constant 0.000000e+00 : f32
    %309 = vector.broadcast %cst_150 : f32 to vector<8x32xf32>
    %310 = arith.maximumf %308, %309 : vector<8x32xf32>
    %311 = arith.addf %246, %310 : vector<8x32xf32>
    %c0_151 = arith.constant 0 : index
    %c0_152 = arith.constant 0 : index
    %312 = vector.load %arg28[%c0_151, %c0_152] : memref<8x32xf32, #tpu.memory_space<vmem>>, vector<8x32xf32>
    tpu.vector_store %arg28[%c0_151, %c0_152], %311 {strides = array<i32>} : memref<8x32xf32, #tpu.memory_space<vmem>>, vector<8x32xf32>,
    %c1_i32_153 = arith.constant 1 : i32
    %313 = arith.cmpi eq, %arg1, %c1_i32_153 : i32
    %314 = arith.extui %313 : i1 to i32
    %c0_i32_154 = arith.constant 0 : i32
    %315 = arith.cmpi ne, %314, %c0_i32_154 : i32
    scf.if %315 {
      %c0_155 = arith.constant 0 : index
      %c0_156 = arith.constant 0 : index
      %316 = vector.load %arg24[%c0_155, %c0_156] : memref<1x32xf32, #tpu.memory_space<vmem>>, vector<1x32xf32>
      %c0_157 = arith.constant 0 : index
      %c0_158 = arith.constant 0 : index
      %317 = vector.load %arg25[%c0_157, %c0_158] : memref<1x32xf32, #tpu.memory_space<vmem>>, vector<1x32xf32>
      %cst_159 = arith.constant dense<0.000000e+00> : vector<8xf32>
      %318 = vector.multi_reduction <add>, %311, %cst_159 [1] : vector<8x32xf32> to vector<8xf32>
      %319 = vector.shape_cast %318 : vector<8xf32> to vector<8x1xf32>
      %cst_160 = arith.constant 3.200000e+01 : f32
      %320 = vector.broadcast %cst_160 : f32 to vector<8x1xf32>
      %321 = arith.divf %319, %320 : vector<8x1xf32>
      %322 = vector.broadcast %321 : vector<8x1xf32> to vector<8x32xf32>
      %323 = arith.subf %311, %322 : vector<8x32xf32>
      %324 = arith.mulf %323, %323 : vector<8x32xf32>
      %cst_161 = arith.constant dense<0.000000e+00> : vector<8xf32>
      %325 = vector.multi_reduction <add>, %324, %cst_161 [1] : vector<8x32xf32> to vector<8xf32>
      %326 = vector.shape_cast %325 : vector<8xf32> to vector<8x1xf32>
      %cst_162 = arith.constant 3.100000e+01 : f32
      %327 = vector.broadcast %cst_162 : f32 to vector<8x1xf32>
      %328 = arith.divf %326, %327 : vector<8x1xf32>
      %329 = vector.broadcast %316 : vector<1x32xf32> to vector<8x32xf32>
      %330 = arith.mulf %329, %323 : vector<8x32xf32>
      %331 = math.sqrt %328 : vector<8x1xf32>
      %cst_163 = arith.constant 9.99999997E-7 : f32
      %332 = vector.broadcast %cst_163 : f32 to vector<8x1xf32>
      %333 = arith.addf %331, %332 : vector<8x1xf32>
      %334 = vector.broadcast %333 : vector<8x1xf32> to vector<8x32xf32>
      %335 = arith.divf %330, %334 : vector<8x32xf32>
      %336 = vector.broadcast %317 : vector<1x32xf32> to vector<8x32xf32>
      %337 = arith.addf %335, %336 : vector<8x32xf32>
      %c0_164 = arith.constant 0 : index
      %c0_165 = arith.constant 0 : index
      %c0_166 = arith.constant 0 : index
      %338 = vector.load %arg26[%c0_164, %c0_165, %c0_166] : memref<1x8x32xf32, #tpu.memory_space<vmem>>, vector<1x8x32xf32>
      %339 = vector.shape_cast %338 : vector<1x8x32xf32> to vector<8x32xf32>
      %340 = vector.shape_cast %337 : vector<8x32xf32> to vector<1x8x32xf32>
      tpu.vector_store %arg26[%c0_164, %c0_165, %c0_166], %340 {strides = array<i32>} : memref<1x8x32xf32, #tpu.memory_space<vmem>>, vector<1x8x32xf32>,
    } else {
    }
    return
  }
  func.func @transform_0(%arg0: i32, %arg1: i32) -> (i32, i32, i32) {
    %c0_i32 = arith.constant 0 : i32
    %c0_i32_0 = arith.constant 0 : i32
    %c0_i32_1 = arith.constant 0 : i32
    return %arg0, %c0_i32, %c0_i32_0 : i32, i32, i32
  }
  func.func @transform_1(%arg0: i32, %arg1: i32) -> (i32, i32, i32) {
    %c0_i32 = arith.constant 0 : i32
    %c0_i32_0 = arith.constant 0 : i32
    %c0_i32_1 = arith.constant 0 : i32
    return %arg0, %c0_i32, %c0_i32_0 : i32, i32, i32
  }
  func.func @transform_2(%arg0: i32, %arg1: i32) -> (i32, i32) {
    %c0_i32 = arith.constant 0 : i32
    %c0_i32_0 = arith.constant 0 : i32
    %c0_i32_1 = arith.constant 0 : i32
    return %c0_i32, %c0_i32_0 : i32, i32
  }
  func.func @transform_3(%arg0: i32, %arg1: i32) -> (i32, i32, i32) {
    %c0_i32 = arith.constant 0 : i32
    %c0_i32_0 = arith.constant 0 : i32
    %c0_i32_1 = arith.constant 0 : i32
    return %arg0, %c0_i32, %c0_i32_0 : i32, i32, i32
  }
  func.func @transform_4(%arg0: i32, %arg1: i32) -> (i32, i32, i32) {
    %c0_i32 = arith.constant 0 : i32
    %c0_i32_0 = arith.constant 0 : i32
    %c0_i32_1 = arith.constant 0 : i32
    return %arg0, %c0_i32, %c0_i32_0 : i32, i32, i32
  }
  func.func @transform_5(%arg0: i32, %arg1: i32) -> (i32, i32) {
    %c0_i32 = arith.constant 0 : i32
    %c0_i32_0 = arith.constant 0 : i32
    %c0_i32_1 = arith.constant 0 : i32
    return %c0_i32, %c0_i32_0 : i32, i32
  }
  func.func @transform_6(%arg0: i32, %arg1: i32) -> (i32, i32) {
    %c0_i32 = arith.constant 0 : i32
    %c0_i32_0 = arith.constant 0 : i32
    %c0_i32_1 = arith.constant 0 : i32
    return %c0_i32, %c0_i32_0 : i32, i32
  }
  func.func @transform_7(%arg0: i32, %arg1: i32) -> (i32, i32, i32) {
    %c0_i32 = arith.constant 0 : i32
    %c0_i32_0 = arith.constant 0 : i32
    %c0_i32_1 = arith.constant 0 : i32
    return %arg1, %c0_i32, %c0_i32_0 : i32, i32, i32
  }
  func.func @transform_8(%arg0: i32, %arg1: i32) -> (i32, i32, i32) {
    %c0_i32 = arith.constant 0 : i32
    %c0_i32_0 = arith.constant 0 : i32
    %c0_i32_1 = arith.constant 0 : i32
    return %arg1, %c0_i32, %c0_i32_0 : i32, i32, i32
  }
  func.func @transform_9(%arg0: i32, %arg1: i32) -> (i32, i32, i32) {
    %c0_i32 = arith.constant 0 : i32
    %c0_i32_0 = arith.constant 0 : i32
    %c0_i32_1 = arith.constant 0 : i32
    return %arg1, %c0_i32, %c0_i32_0 : i32, i32, i32
  }
  func.func @transform_10(%arg0: i32, %arg1: i32) -> (i32, i32, i32) {
    %c0_i32 = arith.constant 0 : i32
    %c0_i32_0 = arith.constant 0 : i32
    %c0_i32_1 = arith.constant 0 : i32
    return %arg1, %c0_i32, %c0_i32_0 : i32, i32, i32
  }
  func.func @transform_11(%arg0: i32, %arg1: i32) -> (i32, i32, i32) {
    %c0_i32 = arith.constant 0 : i32
    %c0_i32_0 = arith.constant 0 : i32
    %c0_i32_1 = arith.constant 0 : i32
    return %arg1, %c0_i32, %c0_i32_0 : i32, i32, i32
  }
  func.func @transform_12(%arg0: i32, %arg1: i32) -> (i32, i32, i32) {
    %c0_i32 = arith.constant 0 : i32
    %c0_i32_0 = arith.constant 0 : i32
    %c0_i32_1 = arith.constant 0 : i32
    return %arg1, %c0_i32, %c0_i32_0 : i32, i32, i32
  }
  func.func @transform_13(%arg0: i32, %arg1: i32) -> (i32, i32, i32) {
    %c0_i32 = arith.constant 0 : i32
    %c0_i32_0 = arith.constant 0 : i32
    %c0_i32_1 = arith.constant 0 : i32
    return %arg1, %c0_i32, %c0_i32_0 : i32, i32, i32
  }
  func.func @transform_14(%arg0: i32, %arg1: i32) -> (i32, i32, i32) {
    %c0_i32 = arith.constant 0 : i32
    %c0_i32_0 = arith.constant 0 : i32
    %c0_i32_1 = arith.constant 0 : i32
    return %arg1, %c0_i32, %c0_i32_0 : i32, i32, i32
  }
  func.func @transform_15(%arg0: i32, %arg1: i32) -> (i32, i32, i32) {
    %c0_i32 = arith.constant 0 : i32
    %c0_i32_0 = arith.constant 0 : i32
    %c0_i32_1 = arith.constant 0 : i32
    return %arg1, %c0_i32, %c0_i32_0 : i32, i32, i32
  }
  func.func @transform_16(%arg0: i32, %arg1: i32) -> (i32, i32, i32) {
    %c0_i32 = arith.constant 0 : i32
    %c0_i32_0 = arith.constant 0 : i32
    %c0_i32_1 = arith.constant 0 : i32
    return %arg1, %c0_i32, %c0_i32_0 : i32, i32, i32
  }
  func.func @transform_17(%arg0: i32, %arg1: i32) -> (i32, i32, i32) {
    %c0_i32 = arith.constant 0 : i32
    %c0_i32_0 = arith.constant 0 : i32
    %c0_i32_1 = arith.constant 0 : i32
    return %arg1, %c0_i32, %c0_i32_0 : i32, i32, i32
  }
  func.func @transform_18(%arg0: i32, %arg1: i32) -> (i32, i32, i32) {
    %c0_i32 = arith.constant 0 : i32
    %c0_i32_0 = arith.constant 0 : i32
    %c0_i32_1 = arith.constant 0 : i32
    return %arg1, %c0_i32, %c0_i32_0 : i32, i32, i32
  }
  func.func @transform_19(%arg0: i32, %arg1: i32) -> (i32, i32, i32) {
    %c0_i32 = arith.constant 0 : i32
    %c0_i32_0 = arith.constant 0 : i32
    %c0_i32_1 = arith.constant 0 : i32
    return %arg1, %c0_i32, %c0_i32_0 : i32, i32, i32
  }
  func.func @transform_20(%arg0: i32, %arg1: i32) -> (i32, i32, i32) {
    %c0_i32 = arith.constant 0 : i32
    %c0_i32_0 = arith.constant 0 : i32
    %c0_i32_1 = arith.constant 0 : i32
    return %arg1, %c0_i32, %c0_i32_0 : i32, i32, i32
  }
  func.func @transform_21(%arg0: i32, %arg1: i32) -> (i32, i32, i32) {
    %c0_i32 = arith.constant 0 : i32
    %c0_i32_0 = arith.constant 0 : i32
    %c0_i32_1 = arith.constant 0 : i32
    return %arg1, %c0_i32, %c0_i32_0 : i32, i32, i32
  }
  func.func @transform_22(%arg0: i32, %arg1: i32) -> (i32, i32) {
    %c0_i32 = arith.constant 0 : i32
    %c0_i32_0 = arith.constant 0 : i32
    %c0_i32_1 = arith.constant 0 : i32
    return %c0_i32, %c0_i32_0 : i32, i32
  }
  func.func @transform_23(%arg0: i32, %arg1: i32) -> (i32, i32) {
    %c0_i32 = arith.constant 0 : i32
    %c0_i32_0 = arith.constant 0 : i32
    %c0_i32_1 = arith.constant 0 : i32
    return %c0_i32, %c0_i32_0 : i32, i32
  }
  func.func @transform_24(%arg0: i32, %arg1: i32) -> (i32, i32, i32) {
    %c0_i32 = arith.constant 0 : i32
    %c0_i32_0 = arith.constant 0 : i32
    %c0_i32_1 = arith.constant 0 : i32
    return %arg0, %c0_i32, %c0_i32_0 : i32, i32, i32
  }
  func.func @transform_25(%arg0: i32, %arg1: i32) -> (i32, i32, i32) {
    %c0_i32 = arith.constant 0 : i32
    %c0_i32_0 = arith.constant 0 : i32
    %c0_i32_1 = arith.constant 0 : i32
    return %arg0, %c0_i32, %c0_i32_0 : i32, i32, i32
  }
}

</mosaic_0001>

<bundles_post_ra>
// kernel: tpu_custom_call.1
= control target key start
LH: loop header
LB: loop body
LE: loop exit
PB: predicated region body
PF: predicated region fallthrough
CT: control target
= control target key end

     0   :  { %s3923_s0 = inlined_call_operand.vmem [shape: bf16[2,8,32], index: 0, kind: input, shape index: {}]   ;;  %s3924_s1 = inlined_call_operand.vmem [shape: bf16[2,10,32], index: 1, kind: input, shape index: {}]   ;;  %s3925_s2 = inlined_call_operand.vmem [shape: f32[8,8], index: 2, kind: input, shape index: {}]   ;;  %s3926_s3 = inlined_call_operand.vmem [shape: f32[2,1,8], index: 3, kind: input, shape index: {}]   ;;  %s3927_s4 = inlined_call_operand.vmem [shape: f32[2,1,10], index: 4, kind: input, shape index: {}]   ;;  %s3928_s5 = inlined_call_operand.vmem [shape: bf16[32,32], index: 5, kind: input, shape index: {}]   ;;  %s3929_s6 = inlined_call_operand.vmem [shape: f32[8,32], index: 6, kind: input, shape index: {}]   ;;  %s3930_s7 = inlined_call_operand.vmem [shape: bf16[2,32,96], index: 7, kind: input, shape index: {}]   ;;  %s3931_s8 = inlined_call_operand.vmem [shape: bf16[2,32,32], index: 8, kind: input, shape index: {}]   ;;  %s3932_s9 = inlined_call_operand.vmem [shape: bf16[2,32,32], index: 9, kind: input, shape index: {}]   ;;  %s3933_s10 = inlined_call_operand.vmem [shape: bf16[2,32,64], index: 10, kind: input, shape index: {}]   ;;  %s3934_s11 = inlined_call_operand.vmem [shape: bf16[2,32,32], index: 11, kind: input, shape index: {}]   ;;  %s3935_s12 = inlined_call_operand.vmem [shape: f32[2,1,32], index: 12, kind: input, shape index: {}]   ;;  %s3936_s13 = inlined_call_operand.vmem [shape: f32[2,1,32], index: 13, kind: input, shape index: {}]   ;;  %s3937_s14 = inlined_call_operand.vmem [shape: f32[2,1,32], index: 14, kind: input, shape index: {}]   ;;  %s3938_s15 = inlined_call_operand.vmem [shape: f32[2,1,32], index: 15, kind: input, shape index: {}]   ;;  %s3939_s16 = inlined_call_operand.vmem [shape: f32[2,1,32], index: 16, kind: input, shape index: {}]   ;;  %s3940_s17 = inlined_call_operand.vmem [shape: f32[2,1,32], index: 17, kind: input, shape index: {}]   ;;  %s3941_s18 = inlined_call_operand.vmem [shape: bf16[2,96,64], index: 18, kind: input, shape index: {}]   ;;  %s3942_s19 = inlined_call_operand.vmem [shape: f32[2,1,64], index: 19, kind: input, shape index: {}]   ;;  %s3943_s20 = inlined_call_operand.vmem [shape: bf16[2,192,32], index: 20, kind: input, shape index: {}]   ;;  %s3944_s21 = inlined_call_operand.vmem [shape: f32[2,1,32], index: 21, kind: input, shape index: {}]   ;;  %s3945_s22 = inlined_call_operand.vmem [shape: f32[1,32], index: 22, kind: input, shape index: {}]   ;;  %s3946_s23 = inlined_call_operand.vmem [shape: f32[1,32], index: 23, kind: input, shape index: {}]   ;;  %s3947_s24 = inlined_call_operand.hbm [shape: f32[2,8,32], index: 24, kind: output, shape index: {0}]   ;;  %s3948_s25 = inlined_call_operand.hbm [shape: f32[2,8,10], index: 25, kind: output, shape index: {1}]  }
   0x1   :  { %3976 = sst [smem:[#allocation31_spill]] %s3923_s0 }
   0x2   :  { %3977 = sst [smem:[#allocation32_spill]] %s3924_s1 }
   0x3   :  { %3978 = sst [smem:[#allocation33_spill]] %s3925_s2 }
   0x4   :  { %3979 = sst [smem:[#allocation34_spill]] %s3926_s3 }
   0x5   :  { %3980 = sst [smem:[#allocation35_spill]] %s3927_s4 }
   0x6   :  { %3981 = sst [smem:[#allocation36_spill]] %s3928_s5 }
   0x7   :  { %3982 = sst [smem:[#allocation37_spill]] %s3929_s6 }
   0x8   :  { %3983 = sst [smem:[#allocation38_spill]] %s3930_s7 }
   0x9   :  { %3984 = sst [smem:[#allocation39_spill]] %s3931_s8 }
   0xa   :  { %3985 = sst [smem:[#allocation40_spill]] %s3932_s9 }
   0xb   :  { %3986 = sst [smem:[#allocation41_spill]] %s3933_s10 }
   0xc   :  { %3987 = sst [smem:[#allocation42_spill]] %s3934_s11 }
   0xd   :  { %3988 = sst [smem:[#allocation43_spill]] %s3941_s18 }
   0xe   :  { %3989 = sst [smem:[#allocation44_spill]] %s3943_s20 }
   0xf   :  { %3990 = sst [smem:[#allocation45_spill]] %s3945_s22 }
  0x10   :  { %3991 = sst [smem:[#allocation46_spill]] %s3946_s23 }
  0x11   :  { %3992 = sst [smem:[#allocation47_spill]] %s3947_s24 }
  0x12   :  { %3993 = sst [smem:[#allocation48_spill]] %s3948_s25 }
  0x13   :  { %31 = vsyncpa [#allocation7], 0 }
  0x14   :  { %33 = vsyncpa [#allocation7 + $0x1], 0 }
  0x15   :  { %34 = vsyncpa [#allocation9], 0 }
  0x16   :  { %36 = vsyncpa [#allocation9 + $0x1], 0  ;;  %s3388_s29 = smov 0   ;;  %s3390_s2 = smov 0  }
  0x17   :  { %s3392_s6 = smov 0   ;;  %s3394_s30 = smov 0  }
  0x18   :  { %s3396_s7 = smov 0   ;;  %s3398_s3 = smov 0  }
  0x19   :  { %s3400_s26 = smov 0   ;;  %s3402_s1 = smov 0  }
  0x1a LB: > { %3994 = sst [smem:[#allocation12_spill]] %s3210_s29  ;;  %s2715_s8 = sadd.s32 4294967295, %s3238_s1   ;;  %s3238_s1 = sphi %s3402_s1, %s42_s1   ;;  %s3234_s26 = sphi %s3400_s26, %s4067_s26   ;;  %s3230_s3 = sphi %s3398_s3, %s4066_s3   ;;  %s3226_s7 = sphi %s3396_s7, %s4065_s7   ;;  %s3222_s30 = sphi %s3394_s30, %s4064_s30   ;;  %s3218_s6 = sphi %s3392_s6, %s4063_s6   ;;  %s3214_s2 = sphi %s3390_s2, %s4062_s2   ;;  %s3210_s29 = sphi %s3388_s29, %s4061_s29  }
  0x1b   : > { %3995 = sst [smem:[#allocation13_spill]] %s3214_s2  ;;  %s2716_s27 = sadd.s32 4294967294, %s3238_s1  }
  0x1c   : > { %3996 = sst [smem:[#allocation14_spill]] %s3218_s6  ;;  %s51_s4 = sadd.s32 1, %s3230_s3 }
  0x1d   : > { %3997 = sst [smem:[#allocation15_spill]] %s3222_s30  ;;  %p52_p0 = scmp.ge.s32.totalorder %s51_s4, 2 }
  0x1e   : > { %3998 = sst [smem:[#allocation16_spill]] %s3226_s7  ;;  %s54_s28 = sadd.s32 1, %s3234_s26 }
  0x1f   : > { %3999 = sst [smem:[#allocation17_spill]] %s3230_s3  ;;  %p670_p1 = scmp.ne.s32.totalorder %s3218_s6, %s3214_s2 }
  0x20   : > { %4000 = sst [smem:[#allocation18_spill]] %s3234_s26  ;;  %p671_p2 = scmp.eq.s32.totalorder %s2715_s8, 3 }
  0x21   : > { %4001 = sst [smem:[#allocation19_spill]] %s3238_s1  ;;  %s4069_s4 = smov (%p52_p0, %s51_s4), 0 }
  0x22   : > { %4002 = sst [smem:[#allocation20_spill]] %s4069_s4  ;;  %s4071_s28 = smov (!%p52_p0, %s54_s28), %s3234_s26 }
  0x23   : > { %p3437_p3 = por %p671_p2, %p670_p1  ;;  %p676_p4 = scmp.ne.s32.totalorder %s3214_s2, %s3210_s29 }
  0x24   : > { %p56_p5 = scmp.ge.s32.totalorder %s4071_s28, 2  ;;  %p677_p6 = scmp.eq.s32.totalorder %s2716_s27, 3 }
  0x25   : > { %s4003_s9 = scalar_select %p3437_p3, 1, 0 }
  0x26   : > { %p2719_p7 = scmp.ge.s32.totalorder %s3238_s1, 1  ;;  %p867_p8 = scmp.lt.s32.totalorder %s3238_s1, 5 }
  0x27   : > { %4004 = sst [smem:[#allocation21_spill]] %s4003_s9  ;;  %s4073_s28 = smov (%p56_p5, %s4071_s28), 0 }
  0x28   : > { %4005 = sst [smem:[#allocation22_spill]] %s4073_s28  ;;  %p3447_p9 = por %p677_p6, %p676_p4 }
  0x29   : > { %p868_p10 = pnand %p2719_p7, %p867_p8  ;;  %s657_s0 = ssub.s32 %s3234_s26, %s4073_s28 }
  0x2a   : > { %s4006_s5 = scalar_select %p3447_p9, 1, 0 }
  0x2b   : > { %s660_s8 = sadd.s32 1, %s3218_s6  ;;  %p658_p11 = scmp.eq.s32.totalorder %s657_s0, 0 }
  0x2c   : > { %4007 = sst [smem:[#allocation23_spill]] %s4006_s5  ;;  %871 = sbr.rel (%p868_p10) target bundleno = 4515 (0x11a3), region = 116 }
  0x2d   : > { %s3455_s4 = scalar_select %p658_p11, %s3218_s6, %s660_s8  }
  0x2f   : > { %4008 = sst [smem:[#allocation24_spill]] %s3455_s4 }
  0x31   : > { %s3458_s27 = sand.u32 1, %s3214_s2   ;;  %p1009_p12 = scmp.lt.s32.totalorder %s3226_s7, 1 }
  0x32   : > { %4009 = sst [smem:[#allocation25_spill]] %s3458_s27  ;;  %s2720_s3 = sshll.u32 %s3458_s27, 3 }
  0x33   : > { %p1024_p13 = scmp.lt.s32.totalorder %s3222_s30, 1  ;;  %s4011_s6 = sld [smem:[#allocation31_spill]] }
  0x34   : > { %s3464_s29 = scalar_select %p1009_p12, %s3226_s7, 1 }
  0x35   : > { %s3467_s0 = scalar_select %p1024_p13, %s3222_s30, 1 }
  0x36   : > { %4010 = sst [smem:[#allocation26_spill]] %s3464_s29  ;;  %s2722_s8 = sshll.u32 %s3464_s29, 2 }
  0x37   : > { %s2915_s28 = sshll.u32 %s3464_s29, 3  ;;  %s4012_s25 = sld [smem:[#allocation32_spill]] }
  0x38   : > { %s2916_s26 = sshll.u32 %s3467_s0, 4  ;;  %s4017_s27 = sld [smem:[#allocation39_spill]] }
  0x39   : > { %s1012_s2 = scalar_lea.vmem %s4011_s6, %s2722_s8  ;;  %s4018_s30 = sld [smem:[#allocation40_spill]] }
  0x3a   : > { %s4020_s10 = sld [smem:[#allocation41_spill]]  ;;  %s2952_s6 = smul.u32 48, %s3467_s0 }
  0x3b   : > { %s4022_s11 = sld [smem:[#allocation42_spill]]  ;;  %s3557_s8 = scalar_lea.vmem [#allocation6], %s2720_s3 }
  0x3d   : > { %s3477_s24 = scalar_lea.vmem %s4012_s25, %s2915_s28  ;;  %s4016_s25 = sld [smem:[#allocation38_spill]] }
  0x3e   : > { %4013 = sst [smem:[#allocation27_spill]] %s3477_s24  ;;  %s3500_s7 = scalar_lea.vmem %s4017_s27, %s2916_s26 }
  0x3f   : > { %s3505_s20 = scalar_lea.vmem %s4018_s30, %s2916_s26  ;;  %s2953_s24 = smul.u32 96, %s3467_s0 }
  0x40   : > { %4019 = sst [smem:[#allocation28_spill]] %s3505_s20  ;;  %s3510_s4 = scalar_lea.vmem %s4020_s10, %s2916_s26 }
  0x41   : > { %4021 = sst [smem:[#allocation29_spill]] %s3510_s4  ;;  %s3515_s1 = scalar_lea.vmem %s4022_s11, %s2916_s26 }
  0x42   : > { %4023 = sst [smem:[#allocation30_spill]] %s3515_s1 }
  0x43   : > { %s3495_s28 = scalar_lea.vmem %s4016_s25, %s2916_s26  ;;  %s4024_s20 = sld [smem:[#allocation43_spill]] }
  0x44   : > { %s4025_s10 = sld [smem:[#allocation44_spill]]  ;;  %s3559_s26 = scalar_lea.vmem [#allocation8], %s2720_s3 }
  0x45   : > { %s4026_s11 = sld [smem:[#allocation15_spill]] }
  0x49   : > { %s3550_s1 = scalar_lea.vmem %s4024_s20, %s2952_s6 }
  0x4a   : > { %s3555_s4 = scalar_lea.vmem %s4025_s10, %s2953_s24 }
  0x4b   : > { %p2737_p0 = scmp.ne.s32.totalorder %s4026_s11, 0 }
  0x4c   : > { %s4027_s27 = sld [smem:[#allocation36_spill]] (!%p2737_p0) }
  0x4d   : > { %1087 = sbr.rel (%p2737_p0) target bundleno = 224 (0xe0), region = 120  ;;  %s4028_s3 = sld [smem:[#allocation37_spill]] (!%p2737_p0) }
  0x52   : > { %v2922_v0 = vld [vmem:[%s4027_s27 + $0x8] sm:$0xff]  ;;  %v2921_v1 = vld [vmem:[%s4027_s27] sm:$0xff]  ;;  %vm1106_vm0 = vcmask 261120  }
  0x53   : > { %1116 = vmatpush.bf16.msra.mxu0 %v2922_v0  ;;  %v1088_v2 = vld [vmem:[%s1012_s2] sm:$0xf] }
  0x54   : > { %v1093_v3 = vld [vmem:[%s4028_s3] sm:$0xff] }
  0x57   : > { %1117 = vmatpush.bf16.msra.mxu0 %v2921_v1 }
  0x5a   : > { %2746 = vmatmul.msk.bf16.vlgmr.msra.gmra.mxu0 %vm1106_vm0, %v1088_v2 }
  0xd7   : > { %v1119_v4 = vpop.f32.mrf.mxu0 }
  0xd8   : > { %v1120_v5 = vadd.f32 %v1119_v4, %v1093_v3 }
  0xda   : > { %1123 = vst.msk [vmem:[#allocation2] sm:$0xff] %vm1106_vm0, %v1120_v5 }
  0xdf   : > { %v1121_v6 = vpop.f32.mrf.mxu0 }
  0xe0 PF: > { %vm1136_vm1 = vcmask 261120   ;;  %v3240_v9 = vmov 32.0   ;;  %v3241_v21 = vmov 31.0   ;;  %v1125_v26 = vlaneseq  ;;  %v2924_v27 = vld [vmem:[%s3495_s28 + $0x8] sm:$0xff]  ;;  %v2923_v29 = vld [vmem:[%s3495_s28] sm:$0xff]  ;;  %s4029_s6 = scalar_lea.vmem %s3935_s12, %s3467_s0  ;;  %s4030_s29 = scalar_lea.vmem %s3936_s13, %s3467_s0 }
  0xe1   : > { %v3571_v7 = vld [vmem:[#allocation2] sm:$0xff]  ;;  %3054 = vrcp.f32 %v3240_v9  ;;  %1223 = vmatpush.bf16.msra.mxu0 %v2924_v27  ;;  %v3242_v32 = vmov 0.0   ;;  %s3974_s11 = smov 64   ;;  %s3244_s5 = smov 96   ;;  %vm1240_vm12 = vcmask 64512   ;;  %vm1373_vm13 = vcmask 130112  }
  0xe2   : > { %v1137_v8 = vsel %vm1136_vm1, %v3571_v7, 0.0  ;;  %3056 = vrcp.f32 %v3241_v21  ;;  %v1126_v28 = vshrl.u32 %v1125_v26, 7  ;;  %v3048_v53 = vld [vmem:[%s4029_s6] ss:$0 sm:$0xff]  ;;  %s3245_s9 = smov 120   ;;  %s3246_s22 = smov 80  }
  0xe3   : > { %1138 = vadd.xlane.f32.xlu0 %v1137_v8  ;;  %v3049_v60 = vld [vmem:[%s4030_s29] ss:$0 sm:$0xff]  ;;  %s4031_s20 = sld [smem:[#allocation26_spill]]  ;;  %s3247_s10 = smov 88   ;;  %vm1444_vm14 = vcmask 195712   ;;  %vm1515_vm15 = vcmask 261312  }
  0xe4   : > { %v1127_v31 = vand.u32 7, %v1126_v28  ;;  %s4032_s2 = sld [smem:[#allocation34_spill]]  ;;  %s3248_s29 = smov 56  }
  0xe5   : > { %1224 = vmatpush.bf16.msra.mxu0 %v2923_v29  ;;  %s4034_s18 = sld [smem:[#allocation33_spill]]  ;;  %s3249_s24 = smov 112  }
  0xe6   : > { %vm1128_vm4 = vcmp.ge.s32.totalorder %v1127_v31, 1  ;;  %vm1131_vm5 = vcmp.ge.s32.totalorder %v1127_v31, 2  ;;  %s3250_s3 = smov 72   ;;  %s3253_s6 = smov 48  }
  0xe7   : > { %v3055_v10 = vpop.eup %3054  ;;  %v3582_v33 = vsel %vm1128_vm4, 1.0, %v3242_v32  ;;  %v3584_v34 = vsel %vm1131_vm5, 1.0, %v3242_v32  ;;  %s3254_s30 = smov 40  }
  0xe8   : > { %v1141_v11 = vmul.f32 32.0, %v3055_v10  ;;  %vm1145_vm2 = vweird.f32 %v3055_v10  ;;  %v3057_v22 = vpop.eup %3056 }
  0xe9   : > { %v1154_v23 = vmul.f32 31.0, %v3057_v22  ;;  %vm1158_vm3 = vweird.f32 %v3057_v22 }
  0xea   : > { %v1142_v12 = vsub.f32 1.0, %v1141_v11  ;;  %s4033_s28 = scalar_lea.vmem %s4032_s2, %s4031_s20  ;;  %s3251_s2 = smov 104  }
  0xeb   : > { %v1155_v24 = vsub.f32 1.0, %v1154_v23  ;;  %v1231_v11 = vld [vmem:[%s4034_s18] sm:$0xff]  ;;  %s3255_s18 = smov 16  }
  0xec   : > { %v1143_v13 = vmul.f32 %v3055_v10, %v1142_v12 }
  0xed   : > { %v1156_v25 = vmul.f32 %v3057_v22, %v1155_v24 }
  0xee   : > { %v1144_v14 = vadd.f32 %v3055_v10, %v1143_v13 }
  0xef   : > { %v1157_v30 = vadd.f32 %v3057_v22, %v1156_v25 }
  0xf0   : > { %v3575_v15 = vsel %vm1145_vm2, %v3055_v10, %v1144_v14  ;;  %v3050_v10 = vld [vmem:[%s4033_s28] ss:$0 sm:$0xff]  ;;  %s3252_s28 = smov 8  }
  0xf1   : > { %v3586_v35 = vsel %vm1158_vm3, %v3057_v22, %v1157_v30  ;;  %v3625_v12 = vmin.f32 %v1231_v11, %v3050_v10  ;;  %v2926_v10 = vld [vmem:[%s3500_s7 + $0x8] sm:$0xff]  ;;  %v2925_v11 = vld [vmem:[%s3500_s7] sm:$0xff]  ;;  %s4037_s7 = sld [smem:[#allocation28_spill]] }
 0x156   : > { %v1139_v16 = vpop.xlane.xlu0 %1138 }
 0x157   : > { %v1147_v17 = vmul.f32 %v3575_v15, %v1139_v16 }
 0x159   : > { %v1148_v18 = vsub.f32 %v3571_v7, %v1147_v17 }
 0x15b   : > { %v1149_v19 = vmul.f32 %v1148_v18, %v1148_v18  ;;  %v1164_v58 = vmul.f32 %v3048_v53, %v1148_v18 }
 0x15d   : > { %v1150_v20 = vsel %vm1136_vm1, %v1149_v19, 0.0 }
 0x15e   : > { %1151 = vadd.xlane.f32.xlu0 %v1150_v20 }
 0x1d1   : > { %v1152_v36 = vpop.xlane.xlu0 %1151 }
 0x1d2   : > { %v1160_v37 = vmul.f32 %v3586_v35, %v1152_v36 }
 0x1d4   : > { %3058 = vrsqrt.f32 %v1160_v37  ;;  %vm1172_vm6 = vcmp.eq.f32.partialorder %v1160_v37, inf  ;;  %v1175_v45 = vand.u32 2147483648, %v1160_v37  ;;  %vm1174_vm7 = vcmp.eq.f32.partialorder %v1160_v37, 0.0 }
 0x1da   : > { %v3059_v38 = vpop.eup %3058 }
 0x1db   : > { %v1166_v39 = vmul.f32 %v3059_v38, %v1160_v37 }
 0x1dd   : > { %v1167_v40 = vmul.f32 %v3059_v38, %v1166_v39 }
 0x1df   : > { %v1168_v41 = vmul.f32 0.5, %v1167_v40 }
 0x1e1   : > { %v1169_v42 = vsub.f32 1.5, %v1168_v41 }
 0x1e3   : > { %v1170_v43 = vmul.f32 %v3059_v38, %v1169_v42 }
 0x1e5   : > { %v1171_v44 = vmul.f32 %v1170_v43, %v1160_v37 }
 0x1e7   : > { %v1173_v46 = vsel %vm1172_vm6, %v1160_v37, %v1171_v44 }
 0x1e8   : > { %v1176_v47 = vsel %vm1174_vm7, %v1175_v45, %v1173_v46  ;;  %vm1707_vm7 = vcmask 80896  }
 0x1e9   : > { %v1177_v48 = vadd.f32 1e-06, %v1176_v47 }
 0x1eb   : > { %3060 = vrcp.f32 %v1177_v48  ;;  %v1189_v52 = vand.u32 2147483648, %v1177_v48  ;;  %v1187_v55 = vand.u32 2147483647, %v1177_v48  ;;  %vm1183_vm9 = vweird.f32 %v1177_v48 }
 0x1ed   : > { %v1190_v57 = vor.u32 1.1754944e-38, %v1189_v52  ;;  %vm1188_vm11 = vcmp.eq.f32.partialorder %v1187_v55, 8.507059e+37 }
 0x1f1   : > { %v3061_v49 = vpop.eup %3060 }
 0x1f2   : > { %v1179_v50 = vmul.f32 %v3061_v49, %v1177_v48  ;;  %vm1184_vm8 = vweird.f32 %v3061_v49 }
 0x1f3   : > { %vm1185_vm10 = vmor %vm1183_vm9, %vm1184_vm8  ;;  %vm1727_vm8 = vcmask 1041408  }
 0x1f4   : > { %v1180_v51 = vsub.f32 1.0, %v1179_v50 }
 0x1f6   : > { %v1181_v54 = vmul.f32 %v3061_v49, %v1180_v51 }
 0x1f8   : > { %v1182_v56 = vadd.f32 %v3061_v49, %v1181_v54 }
 0x1fa   : > { %v1186_v59 = vsel %vm1185_vm10, %v3061_v49, %v1182_v56 }
 0x1fb   : > { %v1191_v61 = vsel %vm1188_vm11, %v1190_v57, %v1186_v59 }
 0x1fc   : > { %v1192_v62 = vmul.f32 %v1191_v61, %v1164_v58 }
 0x1fe   : > { %v1196_v63 = vadd.f32 %v3049_v60, %v1192_v62 }
 0x200   : > { %v1197_v0 = vpack.c.bf16 %v1196_v63, %v1196_v63 }
 0x202   : > { %2757 = vmatmul.msk.bf16.vlgmr.msra.gmra.mxu0 %vm1136_vm1, %v1197_v0 }
 0x27f   : > { %v3600_v1 = vpop.f32.mrf.mxu0 }
 0x280   : > { %1277 = vrot.lane.b32.xlu0 %v3600_v1, %s3974_s11  ;;  %1238 = vrot.lane.b32.xlu1 %v3600_v1, %s3244_s5  ;;  %v1230_v2 = vmul.f32 0.35355338, %v3600_v1  ;;  %s4039_s11 = scalar_lea.vmem %s3938_s15, %s3467_s0 }
 0x282   : > { %1304 = vrot.lane.b32.xlu2 %v1230_v2, %s3245_s9 }
 0x287   : > { %v1228_v3 = vpop.f32.mrf.mxu0 }
 0x288   : > { %1377 = vrot.lane.b32.xlu0 %v3600_v1, %s3246_s22  ;;  %1306 = vrot.lane.b32.xlu1 %v3600_v1, %s3247_s10 }
 0x2dc   : > { %v1305_v9 = vpop.permute.xlu2 %1304 }
 0x2f2   : > { %v1278_v4 = vpop.permute.xlu0 %1277  ;;  %v1239_v5 = vpop.permute.xlu1 %1238 }
 0x2f3   : > { %2758 = vmatpush.xpose.msk.msra.mxu1 %vm1240_vm12, %v1239_v5  ;;  %1298 = vmatpush.msra.mxu2 %v1278_v4 }
 0x2f6   : > { %2759 = vmatmul.msk.f32.vlgmr.msra.gmra.mxu1 %vm1240_vm12, %v1230_v2 }
 0x2fa   : > { %v1378_v6 = vpop.permute.xlu0 %1377  ;;  %v1307_v8 = vpop.permute.xlu1 %1306 }
 0x2fb   : > { %2761 = vmatpush.xpose.msk.msra.mxu3 %vm1240_vm12, %v1307_v8  ;;  %2764 = vmatpush.xpose.msk.msrb.mxu1 %vm1240_vm12, %v1378_v6 }
 0x2fe   : > { %2762 = vmatmul.msk.f32.vlgmr.msra.gmra.mxu3 %vm1240_vm12, %v1305_v9 }
 0x373   : > { %v1263_v13 = vpop.f32.mrf.mxu1 }
 0x374   : > { %v1264_v14 = vadd.f32 %v1263_v13, %v3625_v12 }
 0x376   : > { %v1266_v16 = vsel %vm1240_vm12, %v1264_v14, -inf }
 0x377   : > { %1267 = vmax.xlane.f32.xlu2 %v1266_v16 }
 0x381   : > { %v1329_v17 = vpop.f32.mrf.mxu3 }
 0x382   : > { %v1330_v18 = vadd.f32 %v1329_v17, %v3625_v12 }
 0x384   : > { %v1332_v19 = vsel %vm1240_vm12, %v1330_v18, -inf }
 0x385   : > { %1333 = vmax.xlane.f32.xlu0 %v1332_v19 }
 0x38f   : > { %1343 = vrot.lane.b32.xlu2 %v3600_v1, %s3248_s29  ;;  %s3256_s29 = smov 24  }
 0x399   : > { %1375 = vrot.lane.b32.xlu0 %v1230_v2, %s3249_s24 }
 0x3ea   : > { %v1268_v20 = vpop.xlane.xlu2 %1267 }
 0x3eb   : > { %v1269_v21 = vsub.f32 %v1264_v14, %v1268_v20 }
 0x3ed   : > { %v1270_v22 = vmul.f32 1.442695, %v1269_v21 }
 0x3ef   : > { %3062 = vpow2.f32 %v1270_v22 }
 0x3f2   : > { %v1344_v23 = vpop.permute.xlu2 %1343 }
 0x3f3   : > { %1364 = vmatpush.msrb.mxu2 %v1344_v23 }
 0x3f5   : > { %v3063_v24 = vpop.eup %3062 }
 0x3f6   : > { %v1272_v25 = vsel %vm1240_vm12, %v3063_v24, 0.0 }
 0x3f7   : > { %1273 = vadd.xlane.f32.xlu1 %v1272_v25 }
 0x3f8   : > { %v1334_v26 = vpop.xlane.xlu0 %1333 }
 0x3f9   : > { %v1335_v27 = vsub.f32 %v1330_v18, %v1334_v26 }
 0x3fb   : > { %v1336_v28 = vmul.f32 1.442695, %v1335_v27 }
 0x3fd   : > { %3064 = vpow2.f32 %v1336_v28 }
 0x403   : > { %v3065_v29 = vpop.eup %3064 }
 0x404   : > { %v1338_v30 = vsel %vm1240_vm12, %v3065_v29, 0.0 }
 0x405   : > { %1339 = vadd.xlane.f32.xlu0 %v1338_v30  ;;  %v2927_v30 = vld [vmem:[%s4037_s7] sm:$0xff] }
 0x40b   : > { %v1376_v31 = vpop.permute.xlu0 %1375 }
 0x40c   : > { %2765 = vmatmul.msk.f32.vlgmr.msrb.gmra.mxu1 %vm1240_vm12, %v1376_v31 }
 0x410   : > { %1448 = vrot.lane.b32.xlu1 %v3600_v1, %s3250_s3 }
 0x419   : > { %1446 = vrot.lane.b32.xlu0 %v1230_v2, %s3251_s2 }
 0x46a   : > { %v1274_v32 = vpop.xlane.xlu1 %1273 }
 0x46b   : > { %3066 = vrcp.f32 %v1274_v32 }
 0x471   : > { %v3067_v36 = vpop.eup %3066 }
 0x472   : > { %v1276_v37 = vmul.f32 %v3067_v36, %v3063_v24 }
 0x474   : > { %2760 = vmatmul.msk.f32.vlgmr.msra.gmra.mxu2 %vm1240_vm12, %v1276_v37 }
 0x478   : > { %v1340_v38 = vpop.xlane.xlu0 %1339 }
 0x479   : > { %3068 = vrcp.f32 %v1340_v38 }
 0x47f   : > { %v3069_v39 = vpop.eup %3068 }
 0x480   : > { %v1342_v40 = vmul.f32 %v3069_v39, %v3065_v29  ;;  %v2928_v29 = vld [vmem:[%s4037_s7 + $0x8] sm:$0xff]  ;;  %s4038_s7 = scalar_lea.vmem %s3937_s14, %s3467_s0 }
 0x481   : > { %1626 = vmatpush.bf16.msrb.mxu0 %v2928_v29 }
 0x482   : > { %v1449_v41 = vpop.permute.xlu1 %1448  ;;  %2763 = vmatmul.msk.f32.vlgmr.msrb.gmra.mxu2 %vm1240_vm12, %v1342_v40 }
 0x483   : > { %2767 = vmatpush.xpose.msk.msra.mxu2 %vm1240_vm12, %v1449_v41 }
 0x485   : > { %1627 = vmatpush.bf16.msrb.mxu0 %v2927_v30 }
 0x489   : > { %v1400_v42 = vpop.f32.mrf.mxu1 }
 0x48a   : > { %v1401_v43 = vadd.f32 %v1400_v42, %v3625_v12 }
 0x48b   : > { %v1447_v44 = vpop.permute.xlu0 %1446 }
 0x48c   : > { %2768 = vmatmul.msk.f32.vlgmr.msra.gmra.mxu2 %vm1240_vm12, %v1447_v44  ;;  %v1403_v45 = vsel %vm1240_vm12, %v1401_v43, -inf }
 0x48d   : > { %1404 = vmax.xlane.f32.xlu2 %v1403_v45 }
 0x4f7   : > { %v1300_v46 = vpop.f32.mrf.mxu2 }
 0x4f8   : > { %1303 = vst.msk [vmem:[#allocation3] sm:$0xff] %vm1240_vm12, %v1300_v46 }
 0x500   : > { %v1405_v47 = vpop.xlane.xlu2 %1404 }
 0x501   : > { %v1406_v48 = vsub.f32 %v1401_v43, %v1405_v47 }
 0x503   : > { %v1407_v49 = vmul.f32 1.442695, %v1406_v48 }
 0x505   : > { %3070 = vpow2.f32 %v1407_v49  ;;  %v1366_v50 = vpop.f32.mrf.mxu2 }
 0x50b   : > { %v3071_v51 = vpop.eup %3070 }
 0x50c   : > { %v1409_v52 = vsel %vm1240_vm12, %v3071_v51, 0.0 }
 0x50d   : > { %1410 = vadd.xlane.f32.xlu1 %v1409_v52 }
 0x50f   : > { %v1471_v53 = vpop.f32.mrf.mxu2 }
 0x510   : > { %v1472_v54 = vadd.f32 %v1471_v53, %v3625_v12  ;;  %v3051_v53 = vld [vmem:[%s4038_s7] ss:$0 sm:$0xff] }
 0x512   : > { %v1474_v55 = vsel %vm1240_vm12, %v1472_v54, -inf }
 0x513   : > { %1475 = vmax.xlane.f32.xlu0 %v1474_v55 }
 0x526   : > { %1370 = vrot.lane.b32.xlu1 %v1366_v50, %s3252_s28 }
 0x527   : > { %1414 = vrot.lane.b32.xlu0 %v3600_v1, %s3253_s6  ;;  %s4035_s6 = sld [smem:[#allocation29_spill]] }
 0x52d   : > { %v2931_v20 = vld [vmem:[%s4035_s6 + $0x8] sm:$0xff]  ;;  %v2930_v21 = vld [vmem:[%s4035_s6] sm:$0xff] }
 0x52e   : > { %1666 = vmatpush.bf16.msrb.mxu2 %v2931_v20 }
 0x532   : > { %1667 = vmatpush.bf16.msrb.mxu2 %v2930_v21 }
 0x580   : > { %v1411_v59 = vpop.xlane.xlu1 %1410 }
 0x586   : > { %v1476_v56 = vpop.xlane.xlu0 %1475 }
 0x587   : > { %v1477_v57 = vsub.f32 %v1472_v54, %v1476_v56 }
 0x589   : > { %v1478_v58 = vmul.f32 1.442695, %v1477_v57 }
 0x58b   : > { %3072 = vpow2.f32 %v1478_v58 }
 0x58c   : > { %3074 = vrcp.f32 %v1411_v59 }
 0x591   : > { %v3073_v60 = vpop.eup %3072 }
 0x592   : > { %v1480_v61 = vsel %vm1240_vm12, %v3073_v60, 0.0  ;;  %v3075_v62 = vpop.eup %3074 }
 0x593   : > { %1481 = vadd.xlane.f32.xlu2 %v1480_v61  ;;  %v1413_v2 = vmul.f32 %v3075_v62, %v3071_v51 }
 0x598   : > { %v1371_v63 = vpop.permute.xlu1 %1370 }
 0x599   : > { %1374 = vst.msk [vmem:[#allocation3] sm:$0xff] %vm1373_vm13, %v1371_v63  ;;  %v1415_v0 = vpop.permute.xlu0 %1414 }
 0x59a   : > { %1435 = vmatpush.msrb.mxu3 %v1415_v0 }
 0x59b   : > { %2766 = vmatmul.msk.f32.vlgmr.msrb.gmra.mxu3 %vm1240_vm12, %v1413_v2 }
 0x59c   : > { %1544 = vmatpush.bf16.msra.mxu3 %v2926_v10 }
 0x5a0   : > { %1545 = vmatpush.bf16.msra.mxu3 %v2925_v11 }
 0x5ab   : > { %1485 = vrot.lane.b32.xlu2 %v3600_v1, %s3254_s30  ;;  %s4036_s30 = sld [smem:[#allocation27_spill]] }
 0x5b1   : > { %v2790_v22 = vld [vmem:[%s4036_s30] sm:$0xf]  ;;  %v2929_v23 = vld [vmem:[%s4036_s30] sm:$0x10] }
 0x5b2   : > { %v2791_v24 = vor.u32 %v2929_v23, %v2790_v22 }
 0x5b4   : > { %2800 = vmatmul.msk.bf16.vlgmr.msrb.gmra.mxu2 %vm1136_vm1, %v2791_v24 }
 0x606   : > { %v1482_v3 = vpop.xlane.xlu2 %1481 }
 0x607   : > { %3076 = vrcp.f32 %v1482_v3 }
 0x60d   : > { %v3077_v4 = vpop.eup %3076 }
 0x60e   : > { %v1484_v5 = vmul.f32 %v3077_v4, %v3073_v60  ;;  %v1486_v6 = vpop.permute.xlu2 %1485  ;;  %v3052_v60 = vld [vmem:[%s4039_s11] ss:$0 sm:$0xff]  ;;  %s4040_s11 = sld [smem:[#allocation35_spill]] }
 0x60f   : > { %1506 = vmatpush.msra.mxu1 %v1486_v6 }
 0x610   : > { %2769 = vmatmul.msk.f32.vlgmr.msra.gmra.mxu1 %vm1240_vm12, %v1484_v5 }
 0x61e   : > { %v1437_v8 = vpop.f32.mrf.mxu3 }
 0x61f   : > { %1441 = vrot.lane.b32.xlu0 %v1437_v8, %s3255_s18 }
 0x637   : > { %v3679_v41 = vpop.f32.mrf.mxu2 }
 0x63f   : > { %v3685_v48 = vpop.f32.mrf.mxu2 }
 0x640   : > { %2801 = vmatpush.xpose.msk.msrb.mxu1 %vm1240_vm12, %v3685_v48 }
 0x644   : > { %2802 = vmatpush.xpose.msk.msrb.mxu1 %vm1240_vm12, %v3679_v41 }
 0x68d   : > { %v1508_v9 = vpop.f32.mrf.mxu1 }
 0x68e   : > { %1512 = vrot.lane.b32.xlu0 %v1508_v9, %s3256_s29 }
 0x691   : > { %v1442_v1 = vpop.permute.xlu0 %1441 }
 0x692   : > { %1445 = vst.msk [vmem:[#allocation3] sm:$0xff] %vm1444_vm14, %v1442_v1 }
 0x696   : > { %1755 = vrot.lane.b32.xlu0 %v3685_v48, %s3245_s9 }
 0x69e   : > { %1753 = vrot.lane.b32.xlu0 %v3679_v41, %s3245_s9 }
 0x6a6   : > { %1833 = vrot.lane.b32.xlu0 %v3685_v48, %s3249_s24 }
 0x6ae   : > { %1911 = vrot.lane.b32.xlu0 %v3685_v48, %s3251_s2 }
 0x700   : > { %v1513_v12 = vpop.permute.xlu0 %1512 }
 0x701   : > { %1516 = vst.msk [vmem:[#allocation3] sm:$0xff] %vm1515_vm15, %v1513_v12 }
 0x708   : > { %v1517_v13 = vld [vmem:[#allocation3] sm:$0xff]  ;;  %v1756_v2 = vpop.permute.xlu0 %1755 }
 0x709   : > { %v1518_v14 = vpack.c.bf16 %v1517_v13, %v1517_v13  ;;  %2806 = vmatpush.xpose.msk.msrb.mxu3 %vm1240_vm12, %v1756_v2 }
 0x70b   : > { %2778 = vmatmul.msk.bf16.vlgmr.msra.gmra.mxu3 %vm1136_vm1, %v1518_v14 }
 0x710   : > { %v1754_v3 = vpop.permute.xlu0 %1753 }
 0x711   : > { %2807 = vmatpush.xpose.msk.msrb.mxu3 %vm1240_vm12, %v1754_v3 }
 0x718   : > { %v1834_v6 = vpop.permute.xlu0 %1833 }
 0x719   : > { %2811 = vmatpush.xpose.msk.msra.mxu2 %vm1240_vm12, %v1834_v6 }
 0x720   : > { %v1912_v1 = vpop.permute.xlu0 %1911 }
 0x721   : > { %2816 = vmatpush.xpose.msk.msra.mxu3 %vm1240_vm12, %v1912_v1 }
 0x78e   : > { %v1547_v16 = vpop.f32.mrf.mxu3 }
 0x78f   : > { %v3664_v17 = vadd.f32 %v1547_v16, %v3571_v7 }
 0x791   : > { %v1554_v18 = vsel %vm1136_vm1, %v3664_v17, 0.0 }
 0x792   : > { %1555 = vadd.xlane.f32.xlu2 %v1554_v18 }
 0x796   : > { %v1549_v19 = vpop.f32.mrf.mxu3 }
 0x7aa   : > { %1831 = vrot.lane.b32.xlu2 %v3679_v41, %s3249_s24 }
 0x805   : > { %v1556_v25 = vpop.xlane.xlu2 %1555 }
 0x806   : > { %v1557_v7 = vmul.f32 %v1556_v25, %v3575_v15 }
 0x808   : > { %v1558_v26 = vsub.f32 %v3664_v17, %v1557_v7 }
 0x80a   : > { %v1559_v27 = vmul.f32 %v1558_v26, %v1558_v26  ;;  %v1567_v58 = vmul.f32 %v3051_v53, %v1558_v26 }
 0x80c   : > { %v1560_v28 = vsel %vm1136_vm1, %v1559_v27, 0.0 }
 0x80d   : > { %1561 = vadd.xlane.f32.xlu1 %v1560_v28  ;;  %v1832_v8 = vpop.permute.xlu2 %1831 }
 0x80e   : > { %2812 = vmatpush.xpose.msk.msra.mxu2 %vm1240_vm12, %v1832_v8 }
 0x826   : > { %1909 = vrot.lane.b32.xlu1 %v3679_v41, %s3251_s2 }
 0x880   : > { %v1562_v31 = vpop.xlane.xlu1 %1561 }
 0x881   : > { %v1563_v32 = vmul.f32 %v1562_v31, %v3586_v35 }
 0x883   : > { %3078 = vrsqrt.f32 %v1563_v32  ;;  %vm1575_vm0 = vcmp.eq.f32.partialorder %v1563_v32, inf  ;;  %v1578_v44 = vand.u32 2147483648, %v1563_v32  ;;  %vm1577_vm2 = vcmp.eq.f32.partialorder %v1563_v32, 0.0 }
 0x889   : > { %v3079_v36 = vpop.eup %3078 }
 0x88a   : > { %v1569_v37 = vmul.f32 %v3079_v36, %v1563_v32 }
 0x88c   : > { %v1570_v38 = vmul.f32 %v3079_v36, %v1569_v37 }
 0x88e   : > { %v1571_v39 = vmul.f32 0.5, %v1570_v38 }
 0x890   : > { %v1572_v40 = vsub.f32 1.5, %v1571_v39 }
 0x892   : > { %v1573_v42 = vmul.f32 %v3079_v36, %v1572_v40 }
 0x894   : > { %v1574_v43 = vmul.f32 %v1573_v42, %v1563_v32 }
 0x896   : > { %v1576_v45 = vsel %vm1575_vm0, %v1563_v32, %v1574_v43 }
 0x897   : > { %v1579_v46 = vsel %vm1577_vm2, %v1578_v44, %v1576_v45 }
 0x898   : > { %v1580_v47 = vadd.f32 1e-06, %v1579_v46  ;;  %v1910_v10 = vpop.permute.xlu1 %1909 }
 0x899   : > { %2817 = vmatpush.xpose.msk.msra.mxu3 %vm1240_vm12, %v1910_v10 }
 0x89a   : > { %3080 = vrcp.f32 %v1580_v47  ;;  %v1592_v52 = vand.u32 2147483648, %v1580_v47  ;;  %v1590_v55 = vand.u32 2147483647, %v1580_v47  ;;  %vm1586_vm4 = vweird.f32 %v1580_v47 }
 0x89c   : > { %v1593_v57 = vor.u32 1.1754944e-38, %v1592_v52  ;;  %vm1591_vm6 = vcmp.eq.f32.partialorder %v1590_v55, 8.507059e+37 }
 0x8a0   : > { %v3081_v49 = vpop.eup %3080 }
 0x8a1   : > { %v1582_v50 = vmul.f32 %v3081_v49, %v1580_v47  ;;  %vm1587_vm3 = vweird.f32 %v3081_v49 }
 0x8a2   : > { %vm1588_vm5 = vmor %vm1586_vm4, %vm1587_vm3 }
 0x8a3   : > { %v1583_v51 = vsub.f32 1.0, %v1582_v50 }
 0x8a5   : > { %v1584_v54 = vmul.f32 %v3081_v49, %v1583_v51 }
 0x8a7   : > { %v1585_v56 = vadd.f32 %v3081_v49, %v1584_v54 }
 0x8a9   : > { %v1589_v59 = vsel %vm1588_vm5, %v3081_v49, %v1585_v56 }
 0x8aa   : > { %v1594_v61 = vsel %vm1591_vm6, %v1593_v57, %v1589_v59 }
 0x8ab   : > { %v1595_v62 = vmul.f32 %v1594_v61, %v1567_v58 }
 0x8ad   : > { %v1599_v63 = vadd.f32 %v3052_v60, %v1595_v62 }
 0x8af   : > { %v1600_v0 = vpack.c.bf16 %v1599_v63, %v1599_v63 }
 0x8b1   : > { %2787 = vmatmul.msk.bf16.vlgmr.msrb.gmra.mxu0 %vm1136_vm1, %v1600_v0 }
 0x92e   : > { %v1629_v4 = vpop.f32.mrf.mxu0 }
 0x92f   : > { %v3712_v5 = vmul.f32 0.35355338, %v1629_v4 }
 0x931   : > { %1751 = vrot.lane.b32.xlu0 %v3712_v5, %s3245_s9  ;;  %2803 = vmatmul.msk.f32.vlgmr.msrb.gmra.mxu1 %vm1240_vm12, %v3712_v5  ;;  %s4041_s9 = scalar_lea.vmem %s4040_s11, %s4031_s20 }
 0x932   : > { %v3732_v13 = vld [vmem:[%s4041_s9] ss:$0 sm:$0xff] }
 0x936   : > { %v1631_v9 = vpop.f32.mrf.mxu0 }
 0x939   : > { %1829 = vrot.lane.b32.xlu0 %v3712_v5, %s3249_s24 }
 0x941   : > { %1907 = vrot.lane.b32.xlu0 %v3712_v5, %s3251_s2 }
 0x9a3   : > { %v1752_v11 = vpop.permute.xlu0 %1751 }
 0x9a4   : > { %2808 = vmatmul.msk.f32.vlgmr.msrb.gmra.mxu3 %vm1240_vm12, %v1752_v11 }
 0x9ab   : > { %v1830_v12 = vpop.permute.xlu0 %1829 }
 0x9ac   : > { %2813 = vmatmul.msk.f32.vlgmr.msra.gmra.mxu2 %vm1240_vm12, %v1830_v12 }
 0x9ae   : > { %v1704_v14 = vpop.f32.mrf.mxu1 }
 0x9af   : > { %v1705_v16 = vadd.f32 %v3732_v13, %v1704_v14 }
 0x9b1   : > { %v1708_v18 = vsel %vm1707_vm7, %v1705_v16, -inf }
 0x9b2   : > { %1709 = vmax.xlane.f32.xlu0 %v1708_v18 }
 0x9b3   : > { %v1908_v19 = vpop.permute.xlu0 %1907 }
 0x9b4   : > { %2818 = vmatmul.msk.f32.vlgmr.msra.gmra.mxu3 %vm1240_vm12, %v1908_v19 }
 0xa25   : > { %v1710_v20 = vpop.xlane.xlu0 %1709 }
 0xa26   : > { %v1711_v21 = vsub.f32 %v1705_v16, %v1710_v20 }
 0xa27   : > { %v1780_v22 = vpop.f32.mrf.mxu3 }
 0xa28   : > { %v1712_v23 = vmul.f32 1.442695, %v1711_v21  ;;  %v1781_v24 = vadd.f32 %v3732_v13, %v1780_v22 }
 0xa2a   : > { %3082 = vpow2.f32 %v1712_v23  ;;  %v1783_v25 = vsel %vm1707_vm7, %v1781_v24, -inf }
 0xa2b   : > { %1784 = vmax.xlane.f32.xlu2 %v1783_v25 }
 0xa2f   : > { %v1858_v7 = vpop.f32.mrf.mxu2 }
 0xa30   : > { %v3083_v26 = vpop.eup %3082  ;;  %v1859_v27 = vadd.f32 %v3732_v13, %v1858_v7 }
 0xa31   : > { %v1714_v28 = vsel %vm1707_vm7, %v3083_v26, 0.0 }
 0xa32   : > { %v1861_v29 = vsel %vm1707_vm7, %v1859_v27, -inf }
 0xa33   : > { %1862 = vmax.xlane.f32.xlu1 %v1861_v29  ;;  %1715 = vadd.xlane.f32.xlu2 %v1714_v28 }
 0xa37   : > { %v1936_v30 = vpop.f32.mrf.mxu3 }
 0xa38   : > { %v1937_v31 = vadd.f32 %v3732_v13, %v1936_v30 }
 0xa3a   : > { %v1939_v32 = vsel %vm1707_vm7, %v1937_v31, -inf }
 0xa3b   : > { %1940 = vmax.xlane.f32.xlu0 %v1939_v32 }
 0xa4b   : > { %1796 = vrot.lane.b32.xlu2 %v3685_v48, %s3247_s10 }
 0xa4c   : > { %1719 = vrot.lane.b32.xlu1 %v3679_v41, %s3244_s5 }
 0xa4f   : > { %1721 = vrot.lane.b32.xlu0 %v3685_v48, %s3244_s5  ;;  %s4042_s5 = sld [smem:[#allocation15_spill]] }
 0xa53   : > { %1794 = vrot.lane.b32.xlu2 %v3679_v41, %s3247_s10 }
 0xa55   : > { %p2821_p1 = scmp.ne.s32.totalorder %s4042_s5, 1 }
 0xa5b   : > { %1874 = vrot.lane.b32.xlu2 %v3685_v48, %s3246_s22 }
 0xa63   : > { %1872 = vrot.lane.b32.xlu2 %v3679_v41, %s3246_s22 }
 0xa9e   : > { %v1785_v36 = vpop.xlane.xlu2 %1784 }
 0xa9f   : > { %v1786_v37 = vsub.f32 %v1781_v24, %v1785_v36 }
 0xaa1   : > { %v1787_v38 = vmul.f32 1.442695, %v1786_v37 }
 0xaa3   : > { %3084 = vpow2.f32 %v1787_v38 }
 0xaa6   : > { %v1863_v39 = vpop.xlane.xlu1 %1862  ;;  %v1716_v40 = vpop.xlane.xlu2 %1715 }
 0xaa7   : > { %v1864_v42 = vsub.f32 %v1859_v27, %v1863_v39 }
 0xaa9   : > { %v3085_v43 = vpop.eup %3084  ;;  %v1865_v44 = vmul.f32 1.442695, %v1864_v42 }
 0xaaa   : > { %v1789_v45 = vsel %vm1707_vm7, %v3085_v43, 0.0 }
 0xaab   : > { %3086 = vpow2.f32 %v1865_v44  ;;  %1790 = vadd.xlane.f32.xlu1 %v1789_v45 }
 0xaae   : > { %v1797_v46 = vpop.permute.xlu2 %1796  ;;  %v1941_v47 = vpop.xlane.xlu0 %1940 }
 0xaaf   : > { %v1942_v49 = vsub.f32 %v1937_v31, %v1941_v47  ;;  %2809 = vmatpush.msk.msra.mxu0 %vm1727_vm8, %v1797_v46 }
 0xab1   : > { %v3087_v50 = vpop.eup %3086  ;;  %v1943_v51 = vmul.f32 1.442695, %v1942_v49 }
 0xab2   : > { %v1867_v52 = vsel %vm1707_vm7, %v3087_v50, 0.0 }
 0xab3   : > { %3088 = vpow2.f32 %v1943_v51  ;;  %1868 = vadd.xlane.f32.xlu1 %v1867_v52 }
 0xab4   : > { %3090 = vrcp.f32 %v1716_v40 }
 0xab6   : > { %v1795_v53 = vpop.permute.xlu2 %1794 }
 0xab7   : > { %1819 = vmatpush.msra.mxu0 %v1795_v53 }
 0xab9   : > { %v3089_v54 = vpop.eup %3088 }
 0xaba   : > { %v1945_v55 = vsel %vm1707_vm7, %v3089_v54, 0.0  ;;  %v3091_v57 = vpop.eup %3090 }
 0xabb   : > { %1946 = vadd.xlane.f32.xlu0 %v1945_v55  ;;  %v1718_v59 = vmul.f32 %v3091_v57, %v3083_v26 }
 0xabe   : > { %v1875_v56 = vpop.permute.xlu2 %1874  ;;  %v1720_v60 = vpop.permute.xlu1 %1719 }
 0xac1   : > { %v1722_v58 = vpop.permute.xlu0 %1721 }
 0xac2   : > { %2804 = vmatpush.msk.msra.mxu1 %vm1727_vm8, %v1722_v58 }
 0xac4   : > { %1745 = vmatpush.msra.mxu1 %v1720_v60 }
 0xac5   : > { %2805 = vmatmul.msk.f32.vlgmr.msra.gmra.mxu1 %vm1707_vm7, %v1718_v59 }
 0xac6   : > { %2814 = vmatpush.msk.msrb.mxu1 %vm1727_vm8, %v1875_v56  ;;  %v1873_v61 = vpop.permute.xlu2 %1872 }
 0xac8   : > { %1897 = vmatpush.msrb.mxu1 %v1873_v61 }
 0xacc   : > { %1952 = vrot.lane.b32.xlu1 %v3685_v48, %s3250_s3 }
 0xad4   : > { %1950 = vrot.lane.b32.xlu1 %v3679_v41, %s3250_s3 }
 0xb1e   : > { %v1791_v62 = vpop.xlane.xlu1 %1790 }
 0xb1f   : > { %3092 = vrcp.f32 %v1791_v62 }
 0xb25   : > { %v3093_v63 = vpop.eup %3092 }
 0xb26   : > { %v1793_v0 = vmul.f32 %v3093_v63, %v3085_v43  ;;  %v1869_v2 = vpop.xlane.xlu1 %1868 }
 0xb27   : > { %3094 = vrcp.f32 %v1869_v2 }
 0xb28   : > { %2810 = vmatmul.msk.f32.vlgmr.msra.gmra.mxu0 %vm1707_vm7, %v1793_v0 }
 0xb2d   : > { %v3095_v3 = vpop.eup %3094 }
 0xb2e   : > { %v1871_v4 = vmul.f32 %v3095_v3, %v3087_v50  ;;  %v1947_v6 = vpop.xlane.xlu0 %1946 }
 0xb2f   : > { %3096 = vrcp.f32 %v1947_v6 }
 0xb30   : > { %2815 = vmatmul.msk.f32.vlgmr.msrb.gmra.mxu1 %vm1707_vm7, %v1871_v4 }
 0xb35   : > { %v3097_v1 = vpop.eup %3096 }
 0xb36   : > { %v1949_v10 = vmul.f32 %v3097_v1, %v3089_v54 }
 0xb3e   : > { %v1953_v8 = vpop.permute.xlu1 %1952 }
 0xb3f   : > { %2819 = vmatpush.msk.msrb.mxu0 %vm1727_vm8, %v1953_v8 }
 0xb42   : > { %v1747_v9 = vpop.f32.mrf.mxu1 }
 0xb43   : > { %1750 = vst.msk [vmem:[#allocation3] sm:$0xff] %vm1240_vm12, %v1747_v9 }
 0xb46   : > { %v1951_v11 = vpop.permute.xlu1 %1950 }
 0xb47   : > { %1975 = vmatpush.msrb.mxu0 %v1951_v11 }
 0xb48   : > { %2820 = vmatmul.msk.f32.vlgmr.msrb.gmra.mxu0 %vm1707_vm7, %v1949_v10 }
 0xba5   : > { %v1821_v12 = vpop.f32.mrf.mxu0 }
 0xba6   : > { %1825 = vrot.lane.b32.xlu2 %v1821_v12, %s3252_s28 }
 0xbad   : > { %v1899_v14 = vpop.f32.mrf.mxu1 }
 0xbae   : > { %1903 = vrot.lane.b32.xlu1 %v1899_v14, %s3255_s18 }
 0xbc5   : > { %v1977_v16 = vpop.f32.mrf.mxu0 }
 0xbc6   : > { %1981 = vrot.lane.b32.xlu2 %v1977_v16, %s3256_s29 }
 0xc00   : > { %v1826_v18 = vpop.permute.xlu2 %1825 }
 0xc01   : > { %1828 = vst.msk [vmem:[#allocation3] sm:$0xff] %vm1373_vm13, %v1826_v18 }
 0xc1e   : > { %1988 = sbr.rel (%p2821_p1) target bundleno = 3245 (0xcad), region = 124 }
 0xc20   : > { %v1904_v19 = vpop.permute.xlu1 %1903  ;;  %v1982_v20 = vpop.permute.xlu2 %1981 }
 0xc21   : > { %1906 = vst.msk [vmem:[#allocation3] sm:$0xff] %vm1444_vm14, %v1904_v19 }
 0xc22   : > { %1984 = vst.msk [vmem:[#allocation3] sm:$0xff] %vm1515_vm15, %v1982_v20 }
 0xc23   : > { %2822 = vmatpush.xpose.msk.msra.mxu0 %vm1136_vm1, %v3685_v48 }
 0xc27   : > { %2823 = vmatpush.xpose.msk.msra.mxu0 %vm1136_vm1, %v3679_v41 }
 0xc2a   : > { %2824 = vmatmul.msk.f32.vlgmr.msra.gmra.mxu0 %vm1136_vm1, %v3712_v5 }
 0xca7   : > { %v2012_v21 = vpop.f32.mrf.mxu0 }
 0xca8   : > { %v2015_v22 = vmul.f32 0.25, %v2012_v21 }
 0xcaa   : > { %v2016_v23 = vadd.f32 %v3732_v13, %v2015_v22 }
 0xcac   : > { %2017 = vst.msk [vmem:[%s3559_s26] sm:$0xff] %vm1707_vm7, %v2016_v23 }
 0xcad PF: > { %s4043_s22 = sld [smem:[#allocation30_spill]]  ;;  %v2939_v49 = vld [vmem:[%s3550_s1 + $0x28] sm:$0xff]  ;;  %v2938_v50 = vld [vmem:[%s3550_s1 + $0x20] sm:$0xff]  ;;  %s4044_s24 = scalar_lea.vmem %s3939_s16, %s3467_s0  ;;  %v2937_v9 = vld [vmem:[%s3550_s1 + $0x18] sm:$0xff]  ;;  %vm2108_vm15 = vcmask 523520   ;;  %vm2116_vm0 = vcmask 785920  }
 0xcae   : > { %2178 = vmatpush.bf16.msra.mxu1 %v2939_v49  ;;  %v3098_v55 = vld [vmem:[%s4044_s24] ss:$0 sm:$0xff]  ;;  %s4045_s28 = scalar_lea.vmem %s3940_s17, %s3467_s0  ;;  %s3257_s18 = smov 32   ;;  %v2936_v1 = vld [vmem:[%s3550_s1 + $0x10] sm:$0xff]  ;;  %v2935_v10 = vld [vmem:[%s3550_s1 + $0x8] sm:$0xff]  ;;  %vm2172_vm2 = vcmask 785408  }
 0xcaf   : > { %v3099_v62 = vld [vmem:[%s4045_s28] ss:$0 sm:$0xff]  ;;  %s4046_s29 = smov 64   ;;  %v2951_v19 = vld [vmem:[%s3555_s4 + $0x58] sm:$0xff]  ;;  %v2950_v20 = vld [vmem:[%s3555_s4 + $0x50] sm:$0xff]  ;;  %s4047_s30 = scalar_lea.vmem %s3942_s19, %s3467_s0  ;;  %vm2190_vm3 = vcmask 523264  }
 0xcb0   : > { %v2934_v11 = vld [vmem:[%s3550_s1] sm:$0xff]  ;;  %2327 = vmatpush.bf16.msra.mxu3 %v2951_v19  ;;  %v2949_v21 = vld [vmem:[%s3555_s4 + $0x48] sm:$0xff]  ;;  %v2947_v23 = vld [vmem:[%s3555_s4 + $0x38] sm:$0xff]  ;;  %vm2198_vm4 = vcmask 1048064   ;;  %s4048_s25 = scalar_lea.vmem %s3944_s21, %s3467_s0  ;;  %s4050_s9 = sld [smem:[#allocation45_spill]] (!%p2821_p1) }
 0xcb1   : > { %v2948_v22 = vld [vmem:[%s3555_s4 + $0x40] sm:$0xff]  ;;  %2310 = vmatpush.bf16.msra.mxu2 %v2947_v23  ;;  %s4051_s20 = sld [smem:[#allocation46_spill]] (!%p2821_p1) }
 0xcb2   : > { %2179 = vmatpush.bf16.msra.mxu1 %v2938_v50 }
 0xcb3   : > { %v2933_v24 = vld [vmem:[%s4043_s22 + $0x8] sm:$0xff]  ;;  %v2932_v25 = vld [vmem:[%s4043_s22] sm:$0xff] }
 0xcb4   : > { %2045 = vmatpush.bf16.msra.mxu0 %v2933_v24  ;;  %v2018_v7 = vld [vmem:[#allocation3] sm:$0xff]  ;;  %2328 = vmatpush.bf16.msra.mxu3 %v2950_v20  ;;  %v2946_v24 = vld [vmem:[%s3555_s4 + $0x30] sm:$0xff] }
 0xcb5   : > { %v2019_v48 = vpack.c.bf16 %v2018_v7, %v2018_v7  ;;  %2311 = vmatpush.bf16.msra.mxu2 %v2946_v24  ;;  %v3100_v7 = vld [vmem:[%s4047_s30] ss:$0 sm:$0xff] }
 0xcb6   : > { %2180 = vmatpush.bf16.msra.mxu1 %v2937_v9 }
 0xcb8   : > { %2046 = vmatpush.bf16.msra.mxu0 %v2932_v25  ;;  %2329 = vmatpush.bf16.msra.mxu3 %v2949_v21  ;;  %v2945_v25 = vld [vmem:[%s3555_s4 + $0x28] sm:$0xff] }
 0xcb9   : > { %2312 = vmatpush.bf16.msra.mxu2 %v2945_v25 }
 0xcba   : > { %2181 = vmatpush.bf16.msra.mxu1 %v2936_v1 }
 0xcbb   : > { %2833 = vmatmul.msk.bf16.vlgmr.msra.gmra.mxu0 %vm1136_vm1, %v2019_v48  ;;  %v2944_v48 = vld [vmem:[%s3555_s4 + $0x20] sm:$0xff] }
 0xcbc   : > { %2330 = vmatpush.bf16.msra.mxu3 %v2948_v22 }
 0xcbd   : > { %2313 = vmatpush.bf16.msra.mxu2 %v2944_v48 }
 0xcbe   : > { %2182 = vmatpush.bf16.msra.mxu1 %v2935_v10 }
 0xcc2   : > { %2183 = vmatpush.bf16.msra.mxu1 %v2934_v11 }
 0xd38   : > { %v2048_v41 = vpop.f32.mrf.mxu0 }
 0xd39   : > { %v3795_v5 = vadd.f32 %v2048_v41, %v3664_v17 }
 0xd3b   : > { %v2055_v13 = vsel %vm1136_vm1, %v3795_v5, 0.0 }
 0xd3c   : > { %2056 = vadd.xlane.f32.xlu0 %v2055_v13 }
 0xd40   : > { %v2050_v26 = vpop.f32.mrf.mxu0 }
 0xd41   : > { %v2943_v26 = vld [vmem:[%s3555_s4 + $0x18] sm:$0xff] }
 0xd42   : > { %2314 = vmatpush.bf16.msra.mxu2 %v2943_v26 }
 0xdaf   : > { %v2057_v27 = vpop.xlane.xlu0 %2056 }
 0xdb0   : > { %v2058_v28 = vmul.f32 %v2057_v27, %v3575_v15 }
 0xdb2   : > { %v2059_v29 = vsub.f32 %v3795_v5, %v2058_v28 }
 0xdb4   : > { %v2060_v30 = vmul.f32 %v2059_v29, %v2059_v29  ;;  %v2068_v60 = vmul.f32 %v3098_v55, %v2059_v29 }
 0xdb6   : > { %v2061_v31 = vsel %vm1136_vm1, %v2060_v30, 0.0  ;;  %v2942_v30 = vld [vmem:[%s3555_s4 + $0x10] sm:$0xff] }
 0xdb7   : > { %2062 = vadd.xlane.f32.xlu0 %v2061_v31  ;;  %2315 = vmatpush.bf16.msra.mxu2 %v2942_v30 }
 0xe2a   : > { %v2063_v32 = vpop.xlane.xlu0 %2062 }
 0xe2b   : > { %v2064_v36 = vmul.f32 %v2063_v32, %v3586_v35 }
 0xe2d   : > { %3102 = vrsqrt.f32 %v2064_v36  ;;  %vm2076_vm9 = vcmp.eq.f32.partialorder %v2064_v36, inf  ;;  %v2079_v44 = vand.u32 2147483648, %v2064_v36  ;;  %vm2078_vm10 = vcmp.eq.f32.partialorder %v2064_v36, 0.0 }
 0xe33   : > { %v3103_v17 = vpop.eup %3102 }
 0xe34   : > { %v2070_v37 = vmul.f32 %v3103_v17, %v2064_v36 }
 0xe36   : > { %v2071_v38 = vmul.f32 %v3103_v17, %v2070_v37 }
 0xe38   : > { %v2072_v39 = vmul.f32 0.5, %v2071_v38  ;;  %v2941_v38 = vld [vmem:[%s3555_s4 + $0x8] sm:$0xff] }
 0xe39   : > { %2316 = vmatpush.bf16.msra.mxu2 %v2941_v38 }
 0xe3a   : > { %v2073_v40 = vsub.f32 1.5, %v2072_v39  ;;  %v2940_v39 = vld [vmem:[%s3555_s4] sm:$0xff] }
 0xe3c   : > { %v2074_v42 = vmul.f32 %v3103_v17, %v2073_v40 }
 0xe3d   : > { %2317 = vmatpush.bf16.msra.mxu2 %v2940_v39 }
 0xe3e   : > { %v2075_v43 = vmul.f32 %v2074_v42, %v2064_v36 }
 0xe40   : > { %v2077_v45 = vsel %vm2076_vm9, %v2064_v36, %v2075_v43 }
 0xe41   : > { %v2080_v46 = vsel %vm2078_vm10, %v2079_v44, %v2077_v45  ;;  %v3101_v44 = vld [vmem:[%s4048_s25] ss:$0 sm:$0xff] }
 0xe42   : > { %v2081_v47 = vadd.f32 1e-06, %v2080_v46 }
 0xe44   : > { %3104 = vrcp.f32 %v2081_v47  ;;  %v2093_v54 = vand.u32 2147483648, %v2081_v47  ;;  %v2091_v57 = vand.u32 2147483647, %v2081_v47  ;;  %vm2087_vm12 = vweird.f32 %v2081_v47 }
 0xe46   : > { %v2094_v59 = vor.u32 1.1754944e-38, %v2093_v54  ;;  %vm2092_vm14 = vcmp.eq.f32.partialorder %v2091_v57, 8.507059e+37 }
 0xe4a   : > { %v3105_v51 = vpop.eup %3104 }
 0xe4b   : > { %v2083_v52 = vmul.f32 %v3105_v51, %v2081_v47  ;;  %vm2088_vm11 = vweird.f32 %v3105_v51 }
 0xe4c   : > { %vm2089_vm13 = vmor %vm2087_vm12, %vm2088_vm11 }
 0xe4d   : > { %v2084_v53 = vsub.f32 1.0, %v2083_v52 }
 0xe4f   : > { %v2085_v56 = vmul.f32 %v3105_v51, %v2084_v53 }
 0xe51   : > { %v2086_v58 = vadd.f32 %v3105_v51, %v2085_v56 }
 0xe53   : > { %v2090_v61 = vsel %vm2089_vm13, %v3105_v51, %v2086_v58 }
 0xe54   : > { %v2095_v63 = vsel %vm2092_vm14, %v2094_v59, %v2090_v61 }
 0xe55   : > { %v2096_v0 = vmul.f32 %v2095_v63, %v2068_v60 }
 0xe57   : > { %v2100_v2 = vadd.f32 %v3099_v62, %v2096_v0 }
 0xe59   : > { %v2102_v3 = vrot.slane %v2100_v2, 7  ;;  %2101 = vst.msk [vmem:[#allocation4] sm:$0xff] %vm1136_vm1, %v2100_v2  ;;  %v2110_v6 = vrot.slane %v2100_v2, 6 }
 0xe5b   : > { %v2103_v4 = vmul.f32 %v3582_v33, %v2102_v3  ;;  %v2111_v8 = vmul.f32 %v3584_v34, %v2110_v6 }
 0xe5d   : > { %2105 = vrot.lane.b32.xlu1 %v2103_v4, %s3257_s18 }
 0xe65   : > { %2113 = vrot.lane.b32.xlu1 %v2111_v8, %s4046_s29 }
 0xecf   : > { %v2106_v12 = vpop.permute.xlu1 %2105 }
 0xed0   : > { %2109 = vst.msk [vmem:[#allocation4] sm:$0xff] %vm2108_vm15, %v2106_v12 }
 0xed7   : > { %v2114_v14 = vpop.permute.xlu1 %2113 }
 0xed8   : > { %2117 = vst.msk [vmem:[#allocation4] sm:$0xff] %vm2116_vm0, %v2114_v14 }
 0xedf   : > { %v2118_v16 = vld [vmem:[#allocation4] sm:$0xff] }
 0xee0   : > { %v2119_v18 = vpack.c.bf16 %v2118_v16, %v2118_v16 }
 0xee2   : > { %2858 = vmatmul.msk.bf16.vlgmr.msra.gmra.mxu1 %vm2172_vm2, %v2119_v18 }
 0xf5f   : > { %v2185_v41 = vpop.f32.mrf.mxu1 }
 0xf60   : > { %v2186_v13 = vadd.f32 %v3100_v7, %v2185_v41 }
 0xf62   : > { %v2189_v27 = vmax.f32 %v2186_v13, 0.0 }
 0xf64   : > { %v2200_v28 = vrot.slane %v2189_v27, 6  ;;  %v2192_v29 = vrot.slane %v2189_v27, 7  ;;  %2191 = vst.msk [vmem:[#allocation5] sm:$0xff] %vm2190_vm3, %v2189_v27 }
 0xf66   : > { %v2193_v31 = vmul.f32 %v3582_v33, %v2192_v29  ;;  %v2201_v32 = vmul.f32 %v3584_v34, %v2200_v28 }
 0xf67   : > { %v2187_v36 = vpop.f32.mrf.mxu1 }
 0xf68   : > { %2195 = vrot.lane.b32.xlu2 %v2193_v31, %s4046_s29  ;;  %2202 = vst.msk [vmem:[#allocation5 + $0x8] sm:$0xff] %vm2190_vm3, %v2201_v32 }
 0xf6f   : > { %v2204_v17 = vld [vmem:[#allocation5 + $0x8] sm:$0xff] }
 0xf70   : > { %v2206_v37 = vpack.c.bf16 %v2204_v17, %v2204_v17 }
 0xf72   : > { %2907 = vmatmul.msk.bf16.vlgmr.msra.gmra.mxu3 %vm2190_vm3, %v2206_v37 }
 0xfc2   : > { %v2196_v40 = vpop.permute.xlu2 %2195 }
 0xfc3   : > { %2199 = vst.msk [vmem:[#allocation5] sm:$0xff] %vm2198_vm4, %v2196_v40 }
 0xfca   : > { %v2203_v42 = vld [vmem:[#allocation5] sm:$0xff] }
 0xfcb   : > { %v2205_v33 = vpack.c.bf16 %v2203_v42, %v2203_v42 }
 0xfcd   : > { %2318 = vmatmul.bf16.vlgmr.msra.gmra.mxu2 %v2205_v33 }
 0xff5   : > { %v2332_v34 = vpop.f32.mrf.mxu3 }
 0xffd   : > { %v2334_v43 = vpop.f32.mrf.mxu3 }
0x1050   : > { %v2319_v45 = vpop.f32.mrf.mxu2 }
0x1051   : > { %v2320_v46 = vadd.f32 %v3101_v44, %v2319_v45 }
0x1053   : > { %v2333_v47 = vadd.f32 %v2332_v34, %v2320_v46 }
0x1055   : > { %v2336_v49 = vmax.f32 %v2333_v47, 0.0  ;;  %2341 = sbr.rel (%p2821_p1) target bundleno = 4473 (0x1179), region = 128 }
0x1057   : > { %v2337_v50 = vadd.f32 %v2336_v49, %v3795_v5 }
0x1058   : > { %v2321_v51 = vpop.f32.mrf.mxu2 }
0x1059   : > { %2338 = vst.msk [vmem:[#allocation2] sm:$0xff] %vm1136_vm1, %v2337_v50 }
0x105a   : > { %v2344_v52 = vsel %vm1136_vm1, %v2337_v50, 0.0  ;;  %v3107_v20 = vld [vmem:[%s4051_s20] ss:$0 sm:$0xff] }
0x105b   : > { %2345 = vadd.xlane.f32.xlu0 %v2344_v52 }
0x10ce   : > { %v2346_v53 = vpop.xlane.xlu0 %2345 }
0x10cf   : > { %v2347_v54 = vmul.f32 %v2346_v53, %v3575_v15 }
0x10d1   : > { %v2348_v55 = vsub.f32 %v2337_v50, %v2347_v54 }
0x10d3   : > { %v2349_v56 = vmul.f32 %v2348_v55, %v2348_v55 }
0x10d5   : > { %v2350_v57 = vsel %vm1136_vm1, %v2349_v56, 0.0 }
0x10d6   : > { %2351 = vadd.xlane.f32.xlu0 %v2350_v57 }
0x1149   : > { %v2352_v58 = vpop.xlane.xlu0 %2351 }
0x114a   : > { %v2353_v5 = vmul.f32 %v2352_v58, %v3586_v35  ;;  %v3106_v35 = vld [vmem:[%s4050_s9] ss:$0 sm:$0xff] }
0x114b   : > { %v2357_v18 = vmul.f32 %v3106_v35, %v2348_v55 }
0x114c   : > { %3108 = vrsqrt.f32 %v2353_v5  ;;  %vm2365_vm5 = vcmp.eq.f32.partialorder %v2353_v5, inf  ;;  %v2368_v3 = vand.u32 2147483648, %v2353_v5  ;;  %vm2367_vm6 = vcmp.eq.f32.partialorder %v2353_v5, 0.0 }
0x1152   : > { %v3109_v59 = vpop.eup %3108 }
0x1153   : > { %v2359_v60 = vmul.f32 %v3109_v59, %v2353_v5 }
0x1155   : > { %v2360_v61 = vmul.f32 %v3109_v59, %v2359_v60 }
0x1157   : > { %v2361_v62 = vmul.f32 0.5, %v2360_v61 }
0x1159   : > { %v2362_v63 = vsub.f32 1.5, %v2361_v62 }
0x115b   : > { %v2363_v0 = vmul.f32 %v3109_v59, %v2362_v63 }
0x115d   : > { %v2364_v2 = vmul.f32 %v2363_v0, %v2353_v5 }
0x115f   : > { %v2366_v4 = vsel %vm2365_vm5, %v2353_v5, %v2364_v2 }
0x1160   : > { %v2369_v15 = vsel %vm2367_vm6, %v2368_v3, %v2366_v4 }
0x1161   : > { %v2370_v6 = vadd.f32 1e-06, %v2369_v15 }
0x1163   : > { %3110 = vrcp.f32 %v2370_v6  ;;  %v2382_v10 = vand.u32 2147483648, %v2370_v6  ;;  %v2380_v12 = vand.u32 2147483647, %v2370_v6  ;;  %vm2376_vm8 = vweird.f32 %v2370_v6 }
0x1165   : > { %v2383_v16 = vor.u32 1.1754944e-38, %v2382_v10  ;;  %vm2381_vm10 = vcmp.eq.f32.partialorder %v2380_v12, 8.507059e+37 }
0x1169   : > { %v3111_v8 = vpop.eup %3110 }
0x116a   : > { %v2372_v9 = vmul.f32 %v3111_v8, %v2370_v6  ;;  %vm2377_vm7 = vweird.f32 %v3111_v8 }
0x116b   : > { %vm2378_vm9 = vmor %vm2376_vm8, %vm2377_vm7 }
0x116c   : > { %v2373_v1 = vsub.f32 1.0, %v2372_v9 }
0x116e   : > { %v2374_v11 = vmul.f32 %v3111_v8, %v2373_v1 }
0x1170   : > { %v2375_v14 = vadd.f32 %v3111_v8, %v2374_v11 }
0x1172   : > { %v2379_v19 = vsel %vm2378_vm9, %v3111_v8, %v2375_v14 }
0x1173   : > { %v2384_v21 = vsel %vm2381_vm10, %v2383_v16, %v2379_v19 }
0x1174   : > { %v2385_v22 = vmul.f32 %v2384_v21, %v2357_v18 }
0x1176   : > { %v2389_v23 = vadd.f32 %v3107_v20, %v2385_v22 }
0x1178   : > { %2390 = vst.msk [vmem:[%s3557_s8] sm:$0xff] %vm1136_vm1, %v2389_v23 }
0x1179 PF: > { %s4052_s10 = sld [smem:[#allocation16_spill]]  ;;  %s2409_s6 = sshll.u32 %s3557_s8, 4  ;;  %s2410_s6 = int_to_ptr.vmem [resolvable:$true] %s2409_s6 }
0x117a   : > { %s4053_s24 = sld [smem:[#allocation25_spill]] }
0x117b   : > { %s4055_s29 = sld [smem:[#allocation47_spill]] }
0x117f   : > { %s2911_s2 = sshll.u32 %s4052_s10, 3 }
0x1180   : > { %s2392_s7 = scalar_lea.sflag [#allocation7], %s4053_s24 }
0x1181   : > { %s4056_s23 = smov %s4055_s29  ;;  %s2407_s1 = scalar_lea.hbm %s4055_s29, %s2911_s2 }
0x1182   : > { %s2411_s30 = sshll.u32 %s2407_s1, 4  ;;  %s3132_s9 = scalar_lea.hbm %s4056_s23, 16  ;;  %s2412_s30 = int_to_ptr.hbm [resolvable:$true] %s2411_s30 }
0x1183   : > { %s3126_s25 = sshra.s32 %s2412_s30, 4  ;;  %s3127_s25 = int_to_ptr.hbm [resolvable:$true] %s3126_s25 }
0x1184   : > { %s3128_s4 = scalar_lea.hbm %s3127_s25, 8  ;;  %p3133_p6 = scmp.lt.s32.totalorder %s3127_s25, %s4056_s23 }
0x1185   : > { %p3129_p2 = scmp.ne.s32.totalorder %s3127_s25, %s3128_s4  ;;  %p3134_p7 = scmp.lt.s32.totalorder %s3132_s9, %s3128_s4 }
0x1187   : > { %p3130_p4 = pnand %p3129_p2, %p3437_p3  ;;  %p3135_p8 = por %p3134_p7, %p3133_p6 }
0x1189   : > { %p3131_p5 = pneg %p3130_p4 }
0x118b   : > { %p3136_p10 = pnand %p3135_p8, %p3131_p5 }
0x118d   : > { %3139 = shalt.err (!%p3136_p10)
}
0x118e   : > { %2954 = dma.vmem_to_hbm [thread:$0]  (%p3437_p3), %s2410_s6, 128, %s2412_s30, %s2392_s7  }
0x118f   : > { %s4057_s10 = sld [smem:[#allocation48_spill]]  ;;  %s2423_s18 = sshll.u32 %s3559_s26, 4  ;;  %s2424_s18 = int_to_ptr.vmem [resolvable:$true] %s2423_s18 }
0x1190   : > { %s2397_s1 = scalar_lea.sflag [#allocation9], %s4053_s24 }
0x1195   : > { %s2421_s28 = scalar_lea.hbm %s4057_s10, %s2911_s2  ;;  %s3160_s6 = scalar_lea.hbm %s4057_s10, 16 }
0x1196   : > { %s2425_s29 = sshll.u32 %s2421_s28, 4  ;;  %s2426_s29 = int_to_ptr.hbm [resolvable:$true] %s2425_s29 }
0x1197   : > { %s3154_s25 = sshra.s32 %s2426_s29, 4  ;;  %s3155_s25 = int_to_ptr.hbm [resolvable:$true] %s3154_s25 }
0x1198   : > { %s3156_s4 = scalar_lea.hbm %s3155_s25, 8  ;;  %p3161_p0 = scmp.lt.s32.totalorder %s3155_s25, %s4057_s10 }
0x1199   : > { %p3157_p11 = scmp.ne.s32.totalorder %s3155_s25, %s3156_s4  ;;  %p3162_p1 = scmp.lt.s32.totalorder %s3160_s6, %s3156_s4 }
0x119b   : > { %p3158_p12 = pnand %p3157_p11, %p3437_p3  ;;  %p3163_p2 = por %p3162_p1, %p3161_p0 }
0x119d   : > { %p3159_p13 = pneg %p3158_p12 }
0x119f   : > { %p3164_p4 = pnand %p3163_p2, %p3159_p13 }
0x11a1   : > { %3167 = shalt.err (!%p3164_p4)
}
0x11a2   : > { %2955 = dma.vmem_to_hbm [thread:$0]  (%p3437_p3), %s2424_s18, 128, %s2426_s29, %s2397_s1  }
0x11a3 PF: > { %s4058_s26 = sld [smem:[#allocation19_spill]] }
0x11a4   : > { %s4059_s24 = sld [smem:[#allocation12_spill]] }
0x11a9   : > { %p2965_p5 = scmp.ge.s32.totalorder %s4058_s26, 2 }
0x11aa   : > { %s2437_s9 = sand.u32 1, %s4059_s24  }
0x11ab   : > { %p2959_p6 = pnand %p2965_p5, %p3447_p9  ;;  %s2438_s5 = scalar_lea.sflag [#allocation7], %s2437_s9 }
0x11ad   : > { %p2960_p7 = pneg %p2959_p6 }
0x11af   : > { %3201 = dma.done.wait (%p2960_p7), %s2438_s5, 128  }
0x11b0   : > { %3203 = vsyncadd (%p2960_p7), %s2438_s5, 4294967168  ;;  %s2448_s22 = scalar_lea.sflag [#allocation9], %s2437_s9 }
0x11b1   : > { %3205 = dma.done.wait (%p2960_p7), %s2448_s22, 128  }
0x11b2   : > { %3207 = vsyncadd (%p2960_p7), %s2448_s22, 4294967168  ;;  %s42_s1 = sadd.s32 1, %s4058_s26   ;;  %s4061_s29 = sld [smem:[#allocation13_spill]] }
0x11b3   : > { %p39_p8 = scmp.ge.s32.totalorder %s42_s1, 6   ;;  %s4062_s2 = sld [smem:[#allocation14_spill]] }
0x11b4   : > { %s4063_s6 = sld [smem:[#allocation24_spill]] }
0x11b5   : > { %s4064_s30 = sld [smem:[#allocation17_spill]]  ;;  %41 = sbr.rel (!%p39_p8) target bundleno = 26 (0x1a), region = 234 }
0x11b6   : > { %s4065_s7 = sld [smem:[#allocation18_spill]] }
0x11b7   : > { %s4066_s3 = sld [smem:[#allocation20_spill]] }
0x11b8   : > { %s4067_s26 = sld [smem:[#allocation22_spill]] }
0x11ba   :  { %2454 = vsyncpa [#allocation7], 1 }
0x11bb   :  { %2456 = vsyncpa [#allocation7 + $0x1], 1 }
0x11bc   :  { %2457 = vsyncpa [#allocation9], 1 }
0x11bd   :  { %2459 = vsyncpa [#allocation9 + $0x1], 1 }

</bundles_post_ra>
